<compile_context>
chip_gen: v7x
topology: tpu7x:2x2x1
jax: 0.10.0
libtpu: 0.0.40
codegen_flags: <defaults>
</compile_context>

<pallas_src>
import math

import jax
import jax.numpy as jnp
from jax import lax
from jax.experimental import pallas as pl
from jax.experimental.pallas import tpu as pltpu

# ---------------- synthetic config (small) ----------------
BATCH = 2
PRED_LEN = 6
LABEL_LEN = 2
SEQ_LEN = PRED_LEN + LABEL_LEN          # 8; module's self.pred_len == self.seq_len
NOISE_DIM = 1
X_DIM = 4
D_MODEL = 32
D_FF = 64
N_HEADS = 4
HEAD_DIM = D_MODEL // N_HEADS
TIME_LAYERS = 2
FF_LAYERS = 1                           # single standard FFN block
LN_EPS = 1e-5
NEG_INF = -1e30

assert SEQ_LEN & (SEQ_LEN - 1) == 0, "folded-batch mask uses power-of-two SEQ_LEN"
LOG2_S = SEQ_LEN.bit_length() - 1

# ---------------- packed-parameter slab layout (f32, 128 lanes) ----------------
#   rows l*D .. (l+1)*D       cols 0:3D            : fused wqkv, layer l   (D, 3D)
#   rows ROW_WO .. +D         cols l*D:(l+1)*D     : fused wo, layer l     (D, D)
#                              cols 2D:2D+D_FF     : w1                    (D, D_FF)
#   rows ROW_W2 .. +D_FF      cols 0:D             : w2                    (D_FF, D)
#   row  ROW_VEC              [ln1w0 | ln1b0 | ln1w1 | ln1b1]   (4 x D)
#   row  ROW_VEC+1            [ln2w  | ln2b  | lnfw  | lnfb ]   (4 x D)
#   row  ROW_VEC+2            [b1 (D_FF) | b2 (D)]
ROW_WO = TIME_LAYERS * D_MODEL          # 64
ROW_W2 = ROW_WO + D_MODEL               # 96
ROW_VEC = ROW_W2 + D_FF                 # 160
SLAB_LANES = 128
SLAB_ROWS = ((ROW_VEC + 3 + 7) // 8) * 8   # 168

assert 3 * D_MODEL <= SLAB_LANES
assert 2 * D_MODEL + D_FF <= SLAB_LANES
assert 4 * D_MODEL <= SLAB_LANES
assert D_FF + D_MODEL <= SLAB_LANES


# ---------------- Pallas kernel: full decoder, all batch rows in one shot ----------------
def decoder_kernel(x_ref, slab_ref, out_ref):
    x = x_ref[...]                                           # (B*S, D) f32
    BS = x.shape[0]
    D, E, H, F = D_MODEL, HEAD_DIM, N_HEADS, D_FF
    scale = 1.0 / math.sqrt(HEAD_DIM)

    # block-diagonal causal mask over the folded batch
    row = lax.broadcasted_iota(jnp.int32, (BS, BS), 0)
    col = lax.broadcasted_iota(jnp.int32, (BS, BS), 1)
    mask = (col <= row) & ((row >> LOG2_S) == (col >> LOG2_S))

    def layer_norm(v, w, b):
        mu = jnp.mean(v, axis=-1, keepdims=True)
        var = jnp.mean(jnp.square(v - mu), axis=-1, keepdims=True)
        return (v - mu) * lax.rsqrt(var + LN_EPS) * w + b

    # ---- time_layers causal self-attention sub-layers (post-norm residual) ----
    for l in range(TIME_LAYERS):
        wqkv = slab_ref[l * D:(l + 1) * D, 0:3 * D]                    # (D, 3D)
        wo = slab_ref[ROW_WO:ROW_WO + D, l * D:(l + 1) * D]            # (D, D)
        ln1w = slab_ref[ROW_VEC:ROW_VEC + 1, 2 * l * D:(2 * l + 1) * D]
        ln1b = slab_ref[ROW_VEC:ROW_VEC + 1, (2 * l + 1) * D:(2 * l + 2) * D]

        qkv = jnp.dot(x, wqkv, preferred_element_type=jnp.float32)     # (BS, 3D)
        heads = []
        for h in range(H):
            qh = qkv[:, h * E:(h + 1) * E]
            kh = qkv[:, D + h * E:D + (h + 1) * E]
            vh = qkv[:, 2 * D + h * E:2 * D + (h + 1) * E]
            sc = lax.dot_general(qh, kh, (((1,), (1,)), ((), ())),
                                 preferred_element_type=jnp.float32) * scale
            sc = jnp.where(mask, sc, NEG_INF)
            sc = sc - jnp.max(sc, axis=-1, keepdims=True)
            p = jnp.exp(sc)
            p = p * pl.reciprocal(jnp.sum(p, axis=-1, keepdims=True), approx=True)
            heads.append(jnp.dot(p, vh, preferred_element_type=jnp.float32))
        ctx = jnp.concatenate(heads, axis=-1)                          # (BS, D)
        attn_out = jnp.dot(ctx, wo, preferred_element_type=jnp.float32)
        x = layer_norm(x + attn_out, ln1w, ln1b)

    # ---- feed-forward sub-layer (Conv1d k=1 == Linear), activation = relu ----
    w1 = slab_ref[ROW_WO:ROW_WO + D, 2 * D:2 * D + F]                  # (D, D_FF)
    w2 = slab_ref[ROW_W2:ROW_W2 + F, 0:D]                              # (D_FF, D)
    b1 = slab_ref[ROW_VEC + 2:ROW_VEC + 3, 0:F]
    b2 = slab_ref[ROW_VEC + 2:ROW_VEC + 3, F:F + D]
    ln2w = slab_ref[ROW_VEC + 1:ROW_VEC + 2, 0:D]
    ln2b = slab_ref[ROW_VEC + 1:ROW_VEC + 2, D:2 * D]
    lnfw = slab_ref[ROW_VEC + 1:ROW_VEC + 2, 2 * D:3 * D]
    lnfb = slab_ref[ROW_VEC + 1:ROW_VEC + 2, 3 * D:4 * D]

    y = jnp.dot(x, w1, preferred_element_type=jnp.float32) + b1
    y = jnp.maximum(y, 0.0)
    y = jnp.dot(y, w2, preferred_element_type=jnp.float32) + b2
    x = layer_norm(x + y, ln2w, ln2b)

    # ---- decoder final LayerNorm (projection to x_dim is done in the wrapper) ----
    out_ref[...] = layer_norm(x, lnfw, lnfb)


def decoder_pallas(emb2d, slab):
    BS, D = emb2d.shape
    return pl.pallas_call(
        decoder_kernel,
        out_shape=jax.ShapeDtypeStruct((BS, D), jnp.float32),
        in_specs=[pl.BlockSpec(memory_space=pltpu.MemorySpace.VMEM),
                  pl.BlockSpec(memory_space=pltpu.MemorySpace.VMEM)],
        out_specs=pl.BlockSpec(memory_space=pltpu.MemorySpace.VMEM),
    )(emb2d, slab)


# ---------------- plain-JAX glue: DataEmbedding_wo_temp ----------------
def token_embedding(noise, w_conv):
    # PyTorch: Conv1d(NOISE_DIM, D_MODEL, kernel=3, padding=1, circular, bias=False)
    # noise: (B, S, 1);  w_conv: (D_MODEL, 1, 3)  (PyTorch OIW layout)
    xp = jnp.concatenate([noise[:, -1:, :], noise, noise[:, :1, :]], axis=1)  # circular pad
    xs = jnp.stack([xp[:, k:k + SEQ_LEN, 0] for k in range(3)], axis=-1)      # (B, S, 3)
    return jnp.einsum("bsk,dk->bsd", xs, w_conv[:, 0, :],
                      precision=lax.Precision.HIGHEST)


def positional_embedding(seq_len, d_model):
    pos = jnp.arange(seq_len, dtype=jnp.float32)[:, None]
    div = jnp.exp(jnp.arange(0, d_model, 2, dtype=jnp.float32)
                  * (-math.log(10000.0) / d_model))
    pe = jnp.zeros((seq_len, d_model), jnp.float32)
    pe = pe.at[:, 0::2].set(jnp.sin(pos * div))
    pe = pe.at[:, 1::2].set(jnp.cos(pos * div))
    return pe


def generator_forward(inputs, noise, params, slab):
    # `inputs` is unused by the PyTorch forward (feedback channel unsupported).
    del inputs
    emb = token_embedding(noise, params["w_conv"]) \
        + positional_embedding(SEQ_LEN, D_MODEL)[None]            # dropout -> identity
    B, S, D = emb.shape
    h = decoder_pallas(emb.reshape(B * S, D), slab)               # (B*S, D) post final LN
    ndg_output = (jnp.dot(h, params["wp"], precision=lax.Precision.HIGHEST)
                  + params["bp"]).reshape(B, S, X_DIM)            # lane-dense kernel out;
    out = ndg_output[:, -(PRED_LEN + LABEL_LEN):, :]              # tiny proj fused by XLA
    if out.shape[1] == 1:                                         # torch .squeeze(1)
        out = jnp.squeeze(out, axis=1)
    return out


generator_forward_jit = jax.jit(generator_forward)


# ---------------- deterministic parameter init + packing ----------------
def init_params(key):
    ks = jax.random.split(key, 11)
    n = lambda k, shape, s=0.1: s * jax.random.normal(k, shape, jnp.float32)
    L, H, D, E = TIME_LAYERS, N_HEADS, D_MODEL, HEAD_DIM
    return {
        "w_conv": n(ks[0], (D, NOISE_DIM, 3)),
        "wq": n(ks[1], (L, H, D, E)),
        "wk": n(ks[2], (L, H, D, E)),
        "wv": n(ks[3], (L, H, D, E)),
        "wo": n(ks[4], (L, H, E, D)),
        "ln1w": jnp.ones((L, 1, D), jnp.float32),
        "ln1b": jnp.zeros((L, 1, D), jnp.float32),
        "w1": n(ks[5], (D, D_FF)),
        "b1": n(ks[6], (1, D_FF), 0.02),
        "w2": n(ks[7], (D_FF, D)),
        "b2": n(ks[8], (1, D), 0.02),
        "ln2w": jnp.ones((1, D), jnp.float32),
        "ln2b": jnp.zeros((1, D), jnp.float32),
        "lnfw": jnp.ones((1, D), jnp.float32),
        "lnfb": jnp.zeros((1, D), jnp.float32),
        "wp": n(ks[9], (D, X_DIM)),
        "bp": n(ks[10], (1, X_DIM), 0.02),
    }


def pack_params(p):
    """Pack all in-kernel weights into one lane-dense f32 (SLAB_ROWS, 128) slab."""
    L, H, D, F = TIME_LAYERS, N_HEADS, D_MODEL, D_FF
    slab = jnp.zeros((SLAB_ROWS, SLAB_LANES), jnp.float32)
    for l in range(L):
        wq_c = jnp.concatenate([p["wq"][l, h] for h in range(H)], axis=-1)   # (D, D)
        wk_c = jnp.concatenate([p["wk"][l, h] for h in range(H)], axis=-1)
        wv_c = jnp.concatenate([p["wv"][l, h] for h in range(H)], axis=-1)
        wqkv = jnp.concatenate([wq_c, wk_c, wv_c], axis=-1)                  # (D, 3D)
        slab = slab.at[l * D:(l + 1) * D, 0:3 * D].set(wqkv)
        wo_c = jnp.concatenate([p["wo"][l, h] for h in range(H)], axis=0)    # (D, D)
        slab = slab.at[ROW_WO:ROW_WO + D, l * D:(l + 1) * D].set(wo_c)
        slab = slab.at[ROW_VEC, 2 * l * D:(2 * l + 1) * D].set(p["ln1w"][l, 0])
        slab = slab.at[ROW_VEC, (2 * l + 1) * D:(2 * l + 2) * D].set(p["ln1b"][l, 0])
    slab = slab.at[ROW_WO:ROW_WO + D, 2 * D:2 * D + F].set(p["w1"])
    slab = slab.at[ROW_W2:ROW_W2 + F, 0:D].set(p["w2"])
    slab = slab.at[ROW_VEC + 1, 0:D].set(p["ln2w"][0])
    slab = slab.at[ROW_VEC + 1, D:2 * D].set(p["ln2b"][0])
    slab = slab.at[ROW_VEC + 1, 2 * D:3 * D].set(p["lnfw"][0])
    slab = slab.at[ROW_VEC + 1, 3 * D:4 * D].set(p["lnfb"][0])
    slab = slab.at[ROW_VEC + 2, 0:F].set(p["b1"][0])
    slab = slab.at[ROW_VEC + 2, F:F + D].set(p["b2"][0])
    return slab


# ---------------- pure-JAX reference for correctness ----------------
def decoder_reference(emb, p):
    hp = dict(precision=lax.Precision.HIGHEST)
    x = emb
    B, S, D = x.shape
    scale = 1.0 / math.sqrt(HEAD_DIM)
    causal = jnp.arange(S)[None, :] <= jnp.arange(S)[:, None]

    def ln(v, w, b):
        mu = v.mean(-1, keepdims=True)
        var = jnp.square(v - mu).mean(-1, keepdims=True)
        return (v - mu) / jnp.sqrt(var + LN_EPS) * w + b

    for l in range(TIME_LAYERS):
        attn_out = jnp.zeros_like(x)
        for h in range(N_HEADS):
            qh = jnp.einsum("bsd,de->bse", x, p["wq"][l, h], **hp)
            kh = jnp.einsum("bsd,de->bse", x, p["wk"][l, h], **hp)
            vh = jnp.einsum("bsd,de->bse", x, p["wv"][l, h], **hp)
            sc = jnp.einsum("bse,bte->bst", qh, kh, **hp) * scale
            sc = jnp.where(causal, sc, NEG_INF)
            pr = jax.nn.softmax(sc, axis=-1)
            ctx = jnp.einsum("bst,bte->bse", pr, vh, **hp)
            attn_out = attn_out + jnp.einsum("bse,ed->bsd", ctx, p["wo"][l, h], **hp)
        x = ln(x + attn_out, p["ln1w"][l], p["ln1b"][l])

    y = jnp.maximum(jnp.einsum("bsd,df->bsf", x, p["w1"], **hp) + p["b1"], 0.0)
    y = jnp.einsum("bsf,fd->bsd", y, p["w2"], **hp) + p["b2"]
    x = ln(x + y, p["ln2w"], p["ln2b"])
    x = ln(x, p["lnfw"], p["lnfb"])
    return jnp.einsum("bsd,dx->bsx", x, p["wp"], **hp) + p["bp"]


if __name__ == "__main__":
    root = jax.random.PRNGKey(0)
    kp, kn, ki = jax.random.split(root, 3)
    params = init_params(kp)
    slab = pack_params(params)
    noise = jax.random.normal(kn, (BATCH, SEQ_LEN, NOISE_DIM), jnp.float32)
    inputs = jax.random.normal(ki, (BATCH, SEQ_LEN, X_DIM), jnp.float32)  # unused by forward

    out = jax.block_until_ready(generator_forward_jit(inputs, noise, params, slab))

    emb = token_embedding(noise, params["w_conv"]) + positional_embedding(SEQ_LEN, D_MODEL)[None]
    ref = decoder_reference(emb, params)
    assert out.shape == (BATCH, SEQ_LEN, X_DIM), out.shape
    max_err = float(jnp.max(jnp.abs(out - ref)))
    assert jnp.allclose(out, ref, atol=3e-3, rtol=2e-2), max_err

    print("KERNEL_OK")
</pallas_src>

<mosaic_0001>
module attributes {stable_mosaic.version = 11 : i64} {
  func.func @decoder_kernel(%arg0: memref<16x32xf32, #tpu.memory_space<vmem>>, %arg1: memref<168x128xf32, #tpu.memory_space<vmem>>, %arg2: memref<16x32xf32, #tpu.memory_space<vmem>>) attributes {dimension_semantics = [], scalar_prefetch = 0 : i64, scratch_operands = 0 : i64, tpu.core_type = #tpu.core_type<tc>} {
    %c0 = arith.constant 0 : index
    %c0_0 = arith.constant 0 : index
    %0 = vector.load %arg0[%c0, %c0_0] : memref<16x32xf32, #tpu.memory_space<vmem>>, vector<16x32xf32>
    %1 = tpu.iota {dimensions = array<i32: 0>} : vector<16x16xi32>
    %2 = tpu.iota {dimensions = array<i32: 1>} : vector<16x16xi32>
    %3 = arith.cmpi sle, %2, %1 : vector<16x16xi32>
    %c3_i32 = arith.constant 3 : i32
    %4 = vector.broadcast %c3_i32 : i32 to vector<16x16xi32>
    %5 = arith.shrsi %1, %4 : vector<16x16xi32>
    %c3_i32_1 = arith.constant 3 : i32
    %6 = vector.broadcast %c3_i32_1 : i32 to vector<16x16xi32>
    %7 = arith.shrsi %2, %6 : vector<16x16xi32>
    %8 = arith.cmpi eq, %5, %7 : vector<16x16xi32>
    %9 = arith.andi %3, %8 : vector<16x16xi1>
    %c0_2 = arith.constant 0 : index
    %c0_3 = arith.constant 0 : index
    %10 = vector.load %arg1[%c0_2, %c0_3] : memref<168x128xf32, #tpu.memory_space<vmem>>, vector<32x96xf32>
    %c64 = arith.constant 64 : index
    %c0_4 = arith.constant 0 : index
    %11 = vector.load %arg1[%c64, %c0_4] : memref<168x128xf32, #tpu.memory_space<vmem>>, vector<32x32xf32>
    %c160 = arith.constant 160 : index
    %c0_5 = arith.constant 0 : index
    %12 = vector.load %arg1[%c160, %c0_5] : memref<168x128xf32, #tpu.memory_space<vmem>>, vector<1x32xf32>
    %c160_6 = arith.constant 160 : index
    %c32 = arith.constant 32 : index
    %13 = vector.load %arg1[%c160_6, %c32] : memref<168x128xf32, #tpu.memory_space<vmem>>, vector<1x32xf32>
    %cst = arith.constant dense<0.000000e+00> : vector<16x96xf32>
    %14 = tpu.matmul %0, %10, %cst {dimension_numbers = #tpu.dot_dimension_numbers<[1], [0], [0], [1], [0, 0, 1, 1], [], []>} : vector<16x32xf32>, vector<32x96xf32>, vector<16x96xf32> -> vector<16x96xf32>
    %15 = vector.extract_strided_slice %14 {offsets = [0, 0], sizes = [16, 8], strides = [1, 1]} : vector<16x96xf32> to vector<16x8xf32>
    %16 = vector.extract_strided_slice %14 {offsets = [0, 32], sizes = [16, 8], strides = [1, 1]} : vector<16x96xf32> to vector<16x8xf32>
    %17 = vector.extract_strided_slice %14 {offsets = [0, 64], sizes = [16, 8], strides = [1, 1]} : vector<16x96xf32> to vector<16x8xf32>
    %cst_7 = arith.constant dense<0.000000e+00> : vector<16x16xf32>
    %18 = tpu.matmul %15, %16, %cst_7 {dimension_numbers = #tpu.dot_dimension_numbers<[1], [1], [0], [0], [0, 0, 1, 0], [], []>} : vector<16x8xf32>, vector<16x8xf32>, vector<16x16xf32> -> vector<16x16xf32>
    %cst_8 = arith.constant 0.353553385 : f32
    %19 = vector.broadcast %cst_8 : f32 to vector<16x16xf32>
    %20 = arith.mulf %18, %19 : vector<16x16xf32>
    %cst_9 = arith.constant -1.000000e+30 : f32
    %21 = vector.broadcast %cst_9 : f32 to vector<16x16xf32>
    %22 = arith.select %9, %20, %21 : vector<16x16xi1>, vector<16x16xf32>
    %cst_10 = arith.constant dense<0xFF800000> : vector<16xf32>
    %23 = vector.multi_reduction <maximumf>, %22, %cst_10 [1] : vector<16x16xf32> to vector<16xf32>
    %24 = vector.shape_cast %23 : vector<16xf32> to vector<16x1xf32>
    %25 = vector.broadcast %24 : vector<16x1xf32> to vector<16x16xf32>
    %26 = arith.subf %22, %25 : vector<16x16xf32>
    %27 = math.exp %26 : vector<16x16xf32>
    %cst_11 = arith.constant dense<0.000000e+00> : vector<16xf32>
    %28 = vector.multi_reduction <add>, %27, %cst_11 [1] : vector<16x16xf32> to vector<16xf32>
    %29 = vector.shape_cast %28 : vector<16xf32> to vector<16x1xf32>
    %30 = tpu.reciprocal %29 {approx = true} : vector<16x1xf32> -> vector<16x1xf32>
    %31 = vector.broadcast %30 : vector<16x1xf32> to vector<16x16xf32>
    %32 = arith.mulf %27, %31 : vector<16x16xf32>
    %cst_12 = arith.constant dense<0.000000e+00> : vector<16x8xf32>
    %33 = tpu.matmul %32, %17, %cst_12 {dimension_numbers = #tpu.dot_dimension_numbers<[1], [0], [0], [1], [0, 0, 1, 1], [], []>} : vector<16x16xf32>, vector<16x8xf32>, vector<16x8xf32> -> vector<16x8xf32>
    %34 = vector.extract_strided_slice %14 {offsets = [0, 8], sizes = [16, 8], strides = [1, 1]} : vector<16x96xf32> to vector<16x8xf32>
    %35 = vector.extract_strided_slice %14 {offsets = [0, 40], sizes = [16, 8], strides = [1, 1]} : vector<16x96xf32> to vector<16x8xf32>
    %36 = vector.extract_strided_slice %14 {offsets = [0, 72], sizes = [16, 8], strides = [1, 1]} : vector<16x96xf32> to vector<16x8xf32>
    %cst_13 = arith.constant dense<0.000000e+00> : vector<16x16xf32>
    %37 = tpu.matmul %34, %35, %cst_13 {dimension_numbers = #tpu.dot_dimension_numbers<[1], [1], [0], [0], [0, 0, 1, 0], [], []>} : vector<16x8xf32>, vector<16x8xf32>, vector<16x16xf32> -> vector<16x16xf32>
    %cst_14 = arith.constant 0.353553385 : f32
    %38 = vector.broadcast %cst_14 : f32 to vector<16x16xf32>
    %39 = arith.mulf %37, %38 : vector<16x16xf32>
    %cst_15 = arith.constant -1.000000e+30 : f32
    %40 = vector.broadcast %cst_15 : f32 to vector<16x16xf32>
    %41 = arith.select %9, %39, %40 : vector<16x16xi1>, vector<16x16xf32>
    %cst_16 = arith.constant dense<0xFF800000> : vector<16xf32>
    %42 = vector.multi_reduction <maximumf>, %41, %cst_16 [1] : vector<16x16xf32> to vector<16xf32>
    %43 = vector.shape_cast %42 : vector<16xf32> to vector<16x1xf32>
    %44 = vector.broadcast %43 : vector<16x1xf32> to vector<16x16xf32>
    %45 = arith.subf %41, %44 : vector<16x16xf32>
    %46 = math.exp %45 : vector<16x16xf32>
    %cst_17 = arith.constant dense<0.000000e+00> : vector<16xf32>
    %47 = vector.multi_reduction <add>, %46, %cst_17 [1] : vector<16x16xf32> to vector<16xf32>
    %48 = vector.shape_cast %47 : vector<16xf32> to vector<16x1xf32>
    %49 = tpu.reciprocal %48 {approx = true} : vector<16x1xf32> -> vector<16x1xf32>
    %50 = vector.broadcast %49 : vector<16x1xf32> to vector<16x16xf32>
    %51 = arith.mulf %46, %50 : vector<16x16xf32>
    %cst_18 = arith.constant dense<0.000000e+00> : vector<16x8xf32>
    %52 = tpu.matmul %51, %36, %cst_18 {dimension_numbers = #tpu.dot_dimension_numbers<[1], [0], [0], [1], [0, 0, 1, 1], [], []>} : vector<16x16xf32>, vector<16x8xf32>, vector<16x8xf32> -> vector<16x8xf32>
    %53 = vector.extract_strided_slice %14 {offsets = [0, 16], sizes = [16, 8], strides = [1, 1]} : vector<16x96xf32> to vector<16x8xf32>
    %54 = vector.extract_strided_slice %14 {offsets = [0, 48], sizes = [16, 8], strides = [1, 1]} : vector<16x96xf32> to vector<16x8xf32>
    %55 = vector.extract_strided_slice %14 {offsets = [0, 80], sizes = [16, 8], strides = [1, 1]} : vector<16x96xf32> to vector<16x8xf32>
    %cst_19 = arith.constant dense<0.000000e+00> : vector<16x16xf32>
    %56 = tpu.matmul %53, %54, %cst_19 {dimension_numbers = #tpu.dot_dimension_numbers<[1], [1], [0], [0], [0, 0, 1, 0], [], []>} : vector<16x8xf32>, vector<16x8xf32>, vector<16x16xf32> -> vector<16x16xf32>
    %cst_20 = arith.constant 0.353553385 : f32
    %57 = vector.broadcast %cst_20 : f32 to vector<16x16xf32>
    %58 = arith.mulf %56, %57 : vector<16x16xf32>
    %cst_21 = arith.constant -1.000000e+30 : f32
    %59 = vector.broadcast %cst_21 : f32 to vector<16x16xf32>
    %60 = arith.select %9, %58, %59 : vector<16x16xi1>, vector<16x16xf32>
    %cst_22 = arith.constant dense<0xFF800000> : vector<16xf32>
    %61 = vector.multi_reduction <maximumf>, %60, %cst_22 [1] : vector<16x16xf32> to vector<16xf32>
    %62 = vector.shape_cast %61 : vector<16xf32> to vector<16x1xf32>
    %63 = vector.broadcast %62 : vector<16x1xf32> to vector<16x16xf32>
    %64 = arith.subf %60, %63 : vector<16x16xf32>
    %65 = math.exp %64 : vector<16x16xf32>
    %cst_23 = arith.constant dense<0.000000e+00> : vector<16xf32>
    %66 = vector.multi_reduction <add>, %65, %cst_23 [1] : vector<16x16xf32> to vector<16xf32>
    %67 = vector.shape_cast %66 : vector<16xf32> to vector<16x1xf32>
    %68 = tpu.reciprocal %67 {approx = true} : vector<16x1xf32> -> vector<16x1xf32>
    %69 = vector.broadcast %68 : vector<16x1xf32> to vector<16x16xf32>
    %70 = arith.mulf %65, %69 : vector<16x16xf32>
    %cst_24 = arith.constant dense<0.000000e+00> : vector<16x8xf32>
    %71 = tpu.matmul %70, %55, %cst_24 {dimension_numbers = #tpu.dot_dimension_numbers<[1], [0], [0], [1], [0, 0, 1, 1], [], []>} : vector<16x16xf32>, vector<16x8xf32>, vector<16x8xf32> -> vector<16x8xf32>
    %72 = vector.extract_strided_slice %14 {offsets = [0, 24], sizes = [16, 8], strides = [1, 1]} : vector<16x96xf32> to vector<16x8xf32>
    %73 = vector.extract_strided_slice %14 {offsets = [0, 56], sizes = [16, 8], strides = [1, 1]} : vector<16x96xf32> to vector<16x8xf32>
    %74 = vector.extract_strided_slice %14 {offsets = [0, 88], sizes = [16, 8], strides = [1, 1]} : vector<16x96xf32> to vector<16x8xf32>
    %cst_25 = arith.constant dense<0.000000e+00> : vector<16x16xf32>
    %75 = tpu.matmul %72, %73, %cst_25 {dimension_numbers = #tpu.dot_dimension_numbers<[1], [1], [0], [0], [0, 0, 1, 0], [], []>} : vector<16x8xf32>, vector<16x8xf32>, vector<16x16xf32> -> vector<16x16xf32>
    %cst_26 = arith.constant 0.353553385 : f32
    %76 = vector.broadcast %cst_26 : f32 to vector<16x16xf32>
    %77 = arith.mulf %75, %76 : vector<16x16xf32>
    %cst_27 = arith.constant -1.000000e+30 : f32
    %78 = vector.broadcast %cst_27 : f32 to vector<16x16xf32>
    %79 = arith.select %9, %77, %78 : vector<16x16xi1>, vector<16x16xf32>
    %cst_28 = arith.constant dense<0xFF800000> : vector<16xf32>
    %80 = vector.multi_reduction <maximumf>, %79, %cst_28 [1] : vector<16x16xf32> to vector<16xf32>
    %81 = vector.shape_cast %80 : vector<16xf32> to vector<16x1xf32>
    %82 = vector.broadcast %81 : vector<16x1xf32> to vector<16x16xf32>
    %83 = arith.subf %79, %82 : vector<16x16xf32>
    %84 = math.exp %83 : vector<16x16xf32>
    %cst_29 = arith.constant dense<0.000000e+00> : vector<16xf32>
    %85 = vector.multi_reduction <add>, %84, %cst_29 [1] : vector<16x16xf32> to vector<16xf32>
    %86 = vector.shape_cast %85 : vector<16xf32> to vector<16x1xf32>
    %87 = tpu.reciprocal %86 {approx = true} : vector<16x1xf32> -> vector<16x1xf32>
    %88 = vector.broadcast %87 : vector<16x1xf32> to vector<16x16xf32>
    %89 = arith.mulf %84, %88 : vector<16x16xf32>
    %cst_30 = arith.constant dense<0.000000e+00> : vector<16x8xf32>
    %90 = tpu.matmul %89, %74, %cst_30 {dimension_numbers = #tpu.dot_dimension_numbers<[1], [0], [0], [1], [0, 0, 1, 1], [], []>} : vector<16x16xf32>, vector<16x8xf32>, vector<16x8xf32> -> vector<16x8xf32>
    %91 = tpu.concatenate %33, %52, %71, %90 in 1 : vector<16x8xf32>, vector<16x8xf32>, vector<16x8xf32>, vector<16x8xf32> -> vector<16x32xf32>
    %cst_31 = arith.constant dense<0.000000e+00> : vector<16x32xf32>
    %92 = tpu.matmul %91, %11, %cst_31 {dimension_numbers = #tpu.dot_dimension_numbers<[1], [0], [0], [1], [0, 0, 1, 1], [], []>} : vector<16x32xf32>, vector<32x32xf32>, vector<16x32xf32> -> vector<16x32xf32>
    %93 = arith.addf %0, %92 : vector<16x32xf32>
    %cst_32 = arith.constant dense<0.000000e+00> : vector<16xf32>
    %94 = vector.multi_reduction <add>, %93, %cst_32 [1] : vector<16x32xf32> to vector<16xf32>
    %95 = vector.shape_cast %94 : vector<16xf32> to vector<16x1xf32>
    %cst_33 = arith.constant 3.200000e+01 : f32
    %96 = vector.broadcast %cst_33 : f32 to vector<16x1xf32>
    %97 = arith.divf %95, %96 : vector<16x1xf32>
    %98 = vector.broadcast %97 : vector<16x1xf32> to vector<16x32xf32>
    %99 = arith.subf %93, %98 : vector<16x32xf32>
    %100 = arith.mulf %99, %99 : vector<16x32xf32>
    %cst_34 = arith.constant dense<0.000000e+00> : vector<16xf32>
    %101 = vector.multi_reduction <add>, %100, %cst_34 [1] : vector<16x32xf32> to vector<16xf32>
    %102 = vector.shape_cast %101 : vector<16xf32> to vector<16x1xf32>
    %cst_35 = arith.constant 3.200000e+01 : f32
    %103 = vector.broadcast %cst_35 : f32 to vector<16x1xf32>
    %104 = arith.divf %102, %103 : vector<16x1xf32>
    %105 = vector.broadcast %97 : vector<16x1xf32> to vector<16x32xf32>
    %106 = arith.subf %93, %105 : vector<16x32xf32>
    %cst_36 = arith.constant 9.99999974E-6 : f32
    %107 = vector.broadcast %cst_36 : f32 to vector<16x1xf32>
    %108 = arith.addf %104, %107 : vector<16x1xf32>
    %109 = math.rsqrt %108 : vector<16x1xf32>
    %110 = vector.broadcast %109 : vector<16x1xf32> to vector<16x32xf32>
    %111 = arith.mulf %106, %110 : vector<16x32xf32>
    %112 = vector.broadcast %12 : vector<1x32xf32> to vector<16x32xf32>
    %113 = arith.mulf %111, %112 : vector<16x32xf32>
    %114 = vector.broadcast %13 : vector<1x32xf32> to vector<16x32xf32>
    %115 = arith.addf %113, %114 : vector<16x32xf32>
    %c32_37 = arith.constant 32 : index
    %c0_38 = arith.constant 0 : index
    %116 = vector.load %arg1[%c32_37, %c0_38] : memref<168x128xf32, #tpu.memory_space<vmem>>, vector<32x96xf32>
    %c64_39 = arith.constant 64 : index
    %c32_40 = arith.constant 32 : index
    %117 = vector.load %arg1[%c64_39, %c32_40] : memref<168x128xf32, #tpu.memory_space<vmem>>, vector<32x32xf32>
    %c160_41 = arith.constant 160 : index
    %c64_42 = arith.constant 64 : index
    %118 = vector.load %arg1[%c160_41, %c64_42] : memref<168x128xf32, #tpu.memory_space<vmem>>, vector<1x32xf32>
    %c160_43 = arith.constant 160 : index
    %c96 = arith.constant 96 : index
    %119 = vector.load %arg1[%c160_43, %c96] : memref<168x128xf32, #tpu.memory_space<vmem>>, vector<1x32xf32>
    %cst_44 = arith.constant dense<0.000000e+00> : vector<16x96xf32>
    %120 = tpu.matmul %115, %116, %cst_44 {dimension_numbers = #tpu.dot_dimension_numbers<[1], [0], [0], [1], [0, 0, 1, 1], [], []>} : vector<16x32xf32>, vector<32x96xf32>, vector<16x96xf32> -> vector<16x96xf32>
    %121 = vector.extract_strided_slice %120 {offsets = [0, 0], sizes = [16, 8], strides = [1, 1]} : vector<16x96xf32> to vector<16x8xf32>
    %122 = vector.extract_strided_slice %120 {offsets = [0, 32], sizes = [16, 8], strides = [1, 1]} : vector<16x96xf32> to vector<16x8xf32>
    %123 = vector.extract_strided_slice %120 {offsets = [0, 64], sizes = [16, 8], strides = [1, 1]} : vector<16x96xf32> to vector<16x8xf32>
    %cst_45 = arith.constant dense<0.000000e+00> : vector<16x16xf32>
    %124 = tpu.matmul %121, %122, %cst_45 {dimension_numbers = #tpu.dot_dimension_numbers<[1], [1], [0], [0], [0, 0, 1, 0], [], []>} : vector<16x8xf32>, vector<16x8xf32>, vector<16x16xf32> -> vector<16x16xf32>
    %cst_46 = arith.constant 0.353553385 : f32
    %125 = vector.broadcast %cst_46 : f32 to vector<16x16xf32>
    %126 = arith.mulf %124, %125 : vector<16x16xf32>
    %cst_47 = arith.constant -1.000000e+30 : f32
    %127 = vector.broadcast %cst_47 : f32 to vector<16x16xf32>
    %128 = arith.select %9, %126, %127 : vector<16x16xi1>, vector<16x16xf32>
    %cst_48 = arith.constant dense<0xFF800000> : vector<16xf32>
    %129 = vector.multi_reduction <maximumf>, %128, %cst_48 [1] : vector<16x16xf32> to vector<16xf32>
    %130 = vector.shape_cast %129 : vector<16xf32> to vector<16x1xf32>
    %131 = vector.broadcast %130 : vector<16x1xf32> to vector<16x16xf32>
    %132 = arith.subf %128, %131 : vector<16x16xf32>
    %133 = math.exp %132 : vector<16x16xf32>
    %cst_49 = arith.constant dense<0.000000e+00> : vector<16xf32>
    %134 = vector.multi_reduction <add>, %133, %cst_49 [1] : vector<16x16xf32> to vector<16xf32>
    %135 = vector.shape_cast %134 : vector<16xf32> to vector<16x1xf32>
    %136 = tpu.reciprocal %135 {approx = true} : vector<16x1xf32> -> vector<16x1xf32>
    %137 = vector.broadcast %136 : vector<16x1xf32> to vector<16x16xf32>
    %138 = arith.mulf %133, %137 : vector<16x16xf32>
    %cst_50 = arith.constant dense<0.000000e+00> : vector<16x8xf32>
    %139 = tpu.matmul %138, %123, %cst_50 {dimension_numbers = #tpu.dot_dimension_numbers<[1], [0], [0], [1], [0, 0, 1, 1], [], []>} : vector<16x16xf32>, vector<16x8xf32>, vector<16x8xf32> -> vector<16x8xf32>
    %140 = vector.extract_strided_slice %120 {offsets = [0, 8], sizes = [16, 8], strides = [1, 1]} : vector<16x96xf32> to vector<16x8xf32>
    %141 = vector.extract_strided_slice %120 {offsets = [0, 40], sizes = [16, 8], strides = [1, 1]} : vector<16x96xf32> to vector<16x8xf32>
    %142 = vector.extract_strided_slice %120 {offsets = [0, 72], sizes = [16, 8], strides = [1, 1]} : vector<16x96xf32> to vector<16x8xf32>
    %cst_51 = arith.constant dense<0.000000e+00> : vector<16x16xf32>
    %143 = tpu.matmul %140, %141, %cst_51 {dimension_numbers = #tpu.dot_dimension_numbers<[1], [1], [0], [0], [0, 0, 1, 0], [], []>} : vector<16x8xf32>, vector<16x8xf32>, vector<16x16xf32> -> vector<16x16xf32>
    %cst_52 = arith.constant 0.353553385 : f32
    %144 = vector.broadcast %cst_52 : f32 to vector<16x16xf32>
    %145 = arith.mulf %143, %144 : vector<16x16xf32>
    %cst_53 = arith.constant -1.000000e+30 : f32
    %146 = vector.broadcast %cst_53 : f32 to vector<16x16xf32>
    %147 = arith.select %9, %145, %146 : vector<16x16xi1>, vector<16x16xf32>
    %cst_54 = arith.constant dense<0xFF800000> : vector<16xf32>
    %148 = vector.multi_reduction <maximumf>, %147, %cst_54 [1] : vector<16x16xf32> to vector<16xf32>
    %149 = vector.shape_cast %148 : vector<16xf32> to vector<16x1xf32>
    %150 = vector.broadcast %149 : vector<16x1xf32> to vector<16x16xf32>
    %151 = arith.subf %147, %150 : vector<16x16xf32>
    %152 = math.exp %151 : vector<16x16xf32>
    %cst_55 = arith.constant dense<0.000000e+00> : vector<16xf32>
    %153 = vector.multi_reduction <add>, %152, %cst_55 [1] : vector<16x16xf32> to vector<16xf32>
    %154 = vector.shape_cast %153 : vector<16xf32> to vector<16x1xf32>
    %155 = tpu.reciprocal %154 {approx = true} : vector<16x1xf32> -> vector<16x1xf32>
    %156 = vector.broadcast %155 : vector<16x1xf32> to vector<16x16xf32>
    %157 = arith.mulf %152, %156 : vector<16x16xf32>
    %cst_56 = arith.constant dense<0.000000e+00> : vector<16x8xf32>
    %158 = tpu.matmul %157, %142, %cst_56 {dimension_numbers = #tpu.dot_dimension_numbers<[1], [0], [0], [1], [0, 0, 1, 1], [], []>} : vector<16x16xf32>, vector<16x8xf32>, vector<16x8xf32> -> vector<16x8xf32>
    %159 = vector.extract_strided_slice %120 {offsets = [0, 16], sizes = [16, 8], strides = [1, 1]} : vector<16x96xf32> to vector<16x8xf32>
    %160 = vector.extract_strided_slice %120 {offsets = [0, 48], sizes = [16, 8], strides = [1, 1]} : vector<16x96xf32> to vector<16x8xf32>
    %161 = vector.extract_strided_slice %120 {offsets = [0, 80], sizes = [16, 8], strides = [1, 1]} : vector<16x96xf32> to vector<16x8xf32>
    %cst_57 = arith.constant dense<0.000000e+00> : vector<16x16xf32>
    %162 = tpu.matmul %159, %160, %cst_57 {dimension_numbers = #tpu.dot_dimension_numbers<[1], [1], [0], [0], [0, 0, 1, 0], [], []>} : vector<16x8xf32>, vector<16x8xf32>, vector<16x16xf32> -> vector<16x16xf32>
    %cst_58 = arith.constant 0.353553385 : f32
    %163 = vector.broadcast %cst_58 : f32 to vector<16x16xf32>
    %164 = arith.mulf %162, %163 : vector<16x16xf32>
    %cst_59 = arith.constant -1.000000e+30 : f32
    %165 = vector.broadcast %cst_59 : f32 to vector<16x16xf32>
    %166 = arith.select %9, %164, %165 : vector<16x16xi1>, vector<16x16xf32>
    %cst_60 = arith.constant dense<0xFF800000> : vector<16xf32>
    %167 = vector.multi_reduction <maximumf>, %166, %cst_60 [1] : vector<16x16xf32> to vector<16xf32>
    %168 = vector.shape_cast %167 : vector<16xf32> to vector<16x1xf32>
    %169 = vector.broadcast %168 : vector<16x1xf32> to vector<16x16xf32>
    %170 = arith.subf %166, %169 : vector<16x16xf32>
    %171 = math.exp %170 : vector<16x16xf32>
    %cst_61 = arith.constant dense<0.000000e+00> : vector<16xf32>
    %172 = vector.multi_reduction <add>, %171, %cst_61 [1] : vector<16x16xf32> to vector<16xf32>
    %173 = vector.shape_cast %172 : vector<16xf32> to vector<16x1xf32>
    %174 = tpu.reciprocal %173 {approx = true} : vector<16x1xf32> -> vector<16x1xf32>
    %175 = vector.broadcast %174 : vector<16x1xf32> to vector<16x16xf32>
    %176 = arith.mulf %171, %175 : vector<16x16xf32>
    %cst_62 = arith.constant dense<0.000000e+00> : vector<16x8xf32>
    %177 = tpu.matmul %176, %161, %cst_62 {dimension_numbers = #tpu.dot_dimension_numbers<[1], [0], [0], [1], [0, 0, 1, 1], [], []>} : vector<16x16xf32>, vector<16x8xf32>, vector<16x8xf32> -> vector<16x8xf32>
    %178 = vector.extract_strided_slice %120 {offsets = [0, 24], sizes = [16, 8], strides = [1, 1]} : vector<16x96xf32> to vector<16x8xf32>
    %179 = vector.extract_strided_slice %120 {offsets = [0, 56], sizes = [16, 8], strides = [1, 1]} : vector<16x96xf32> to vector<16x8xf32>
    %180 = vector.extract_strided_slice %120 {offsets = [0, 88], sizes = [16, 8], strides = [1, 1]} : vector<16x96xf32> to vector<16x8xf32>
    %cst_63 = arith.constant dense<0.000000e+00> : vector<16x16xf32>
    %181 = tpu.matmul %178, %179, %cst_63 {dimension_numbers = #tpu.dot_dimension_numbers<[1], [1], [0], [0], [0, 0, 1, 0], [], []>} : vector<16x8xf32>, vector<16x8xf32>, vector<16x16xf32> -> vector<16x16xf32>
    %cst_64 = arith.constant 0.353553385 : f32
    %182 = vector.broadcast %cst_64 : f32 to vector<16x16xf32>
    %183 = arith.mulf %181, %182 : vector<16x16xf32>
    %cst_65 = arith.constant -1.000000e+30 : f32
    %184 = vector.broadcast %cst_65 : f32 to vector<16x16xf32>
    %185 = arith.select %9, %183, %184 : vector<16x16xi1>, vector<16x16xf32>
    %cst_66 = arith.constant dense<0xFF800000> : vector<16xf32>
    %186 = vector.multi_reduction <maximumf>, %185, %cst_66 [1] : vector<16x16xf32> to vector<16xf32>
    %187 = vector.shape_cast %186 : vector<16xf32> to vector<16x1xf32>
    %188 = vector.broadcast %187 : vector<16x1xf32> to vector<16x16xf32>
    %189 = arith.subf %185, %188 : vector<16x16xf32>
    %190 = math.exp %189 : vector<16x16xf32>
    %cst_67 = arith.constant dense<0.000000e+00> : vector<16xf32>
    %191 = vector.multi_reduction <add>, %190, %cst_67 [1] : vector<16x16xf32> to vector<16xf32>
    %192 = vector.shape_cast %191 : vector<16xf32> to vector<16x1xf32>
    %193 = tpu.reciprocal %192 {approx = true} : vector<16x1xf32> -> vector<16x1xf32>
    %194 = vector.broadcast %193 : vector<16x1xf32> to vector<16x16xf32>
    %195 = arith.mulf %190, %194 : vector<16x16xf32>
    %cst_68 = arith.constant dense<0.000000e+00> : vector<16x8xf32>
    %196 = tpu.matmul %195, %180, %cst_68 {dimension_numbers = #tpu.dot_dimension_numbers<[1], [0], [0], [1], [0, 0, 1, 1], [], []>} : vector<16x16xf32>, vector<16x8xf32>, vector<16x8xf32> -> vector<16x8xf32>
    %197 = tpu.concatenate %139, %158, %177, %196 in 1 : vector<16x8xf32>, vector<16x8xf32>, vector<16x8xf32>, vector<16x8xf32> -> vector<16x32xf32>
    %cst_69 = arith.constant dense<0.000000e+00> : vector<16x32xf32>
    %198 = tpu.matmul %197, %117, %cst_69 {dimension_numbers = #tpu.dot_dimension_numbers<[1], [0], [0], [1], [0, 0, 1, 1], [], []>} : vector<16x32xf32>, vector<32x32xf32>, vector<16x32xf32> -> vector<16x32xf32>
    %199 = arith.addf %115, %198 : vector<16x32xf32>
    %cst_70 = arith.constant dense<0.000000e+00> : vector<16xf32>
    %200 = vector.multi_reduction <add>, %199, %cst_70 [1] : vector<16x32xf32> to vector<16xf32>
    %201 = vector.shape_cast %200 : vector<16xf32> to vector<16x1xf32>
    %cst_71 = arith.constant 3.200000e+01 : f32
    %202 = vector.broadcast %cst_71 : f32 to vector<16x1xf32>
    %203 = arith.divf %201, %202 : vector<16x1xf32>
    %204 = vector.broadcast %203 : vector<16x1xf32> to vector<16x32xf32>
    %205 = arith.subf %199, %204 : vector<16x32xf32>
    %206 = arith.mulf %205, %205 : vector<16x32xf32>
    %cst_72 = arith.constant dense<0.000000e+00> : vector<16xf32>
    %207 = vector.multi_reduction <add>, %206, %cst_72 [1] : vector<16x32xf32> to vector<16xf32>
    %208 = vector.shape_cast %207 : vector<16xf32> to vector<16x1xf32>
    %cst_73 = arith.constant 3.200000e+01 : f32
    %209 = vector.broadcast %cst_73 : f32 to vector<16x1xf32>
    %210 = arith.divf %208, %209 : vector<16x1xf32>
    %211 = vector.broadcast %203 : vector<16x1xf32> to vector<16x32xf32>
    %212 = arith.subf %199, %211 : vector<16x32xf32>
    %cst_74 = arith.constant 9.99999974E-6 : f32
    %213 = vector.broadcast %cst_74 : f32 to vector<16x1xf32>
    %214 = arith.addf %210, %213 : vector<16x1xf32>
    %215 = math.rsqrt %214 : vector<16x1xf32>
    %216 = vector.broadcast %215 : vector<16x1xf32> to vector<16x32xf32>
    %217 = arith.mulf %212, %216 : vector<16x32xf32>
    %218 = vector.broadcast %118 : vector<1x32xf32> to vector<16x32xf32>
    %219 = arith.mulf %217, %218 : vector<16x32xf32>
    %220 = vector.broadcast %119 : vector<1x32xf32> to vector<16x32xf32>
    %221 = arith.addf %219, %220 : vector<16x32xf32>
    %c64_75 = arith.constant 64 : index
    %c64_76 = arith.constant 64 : index
    %222 = vector.load %arg1[%c64_75, %c64_76] : memref<168x128xf32, #tpu.memory_space<vmem>>, vector<32x64xf32>
    %c96_77 = arith.constant 96 : index
    %c0_78 = arith.constant 0 : index
    %223 = vector.load %arg1[%c96_77, %c0_78] : memref<168x128xf32, #tpu.memory_space<vmem>>, vector<64x32xf32>
    %c162 = arith.constant 162 : index
    %c0_79 = arith.constant 0 : index
    %224 = vector.load %arg1[%c162, %c0_79] : memref<168x128xf32, #tpu.memory_space<vmem>>, vector<1x64xf32>
    %c162_80 = arith.constant 162 : index
    %c64_81 = arith.constant 64 : index
    %225 = vector.load %arg1[%c162_80, %c64_81] : memref<168x128xf32, #tpu.memory_space<vmem>>, vector<1x32xf32>
    %c161 = arith.constant 161 : index
    %c0_82 = arith.constant 0 : index
    %226 = vector.load %arg1[%c161, %c0_82] : memref<168x128xf32, #tpu.memory_space<vmem>>, vector<1x32xf32>
    %c161_83 = arith.constant 161 : index
    %c32_84 = arith.constant 32 : index
    %227 = vector.load %arg1[%c161_83, %c32_84] : memref<168x128xf32, #tpu.memory_space<vmem>>, vector<1x32xf32>
    %c161_85 = arith.constant 161 : index
    %c64_86 = arith.constant 64 : index
    %228 = vector.load %arg1[%c161_85, %c64_86] : memref<168x128xf32, #tpu.memory_space<vmem>>, vector<1x32xf32>
    %c161_87 = arith.constant 161 : index
    %c96_88 = arith.constant 96 : index
    %229 = vector.load %arg1[%c161_87, %c96_88] : memref<168x128xf32, #tpu.memory_space<vmem>>, vector<1x32xf32>
    %cst_89 = arith.constant dense<0.000000e+00> : vector<16x64xf32>
    %230 = tpu.matmul %221, %222, %cst_89 {dimension_numbers = #tpu.dot_dimension_numbers<[1], [0], [0], [1], [0, 0, 1, 1], [], []>} : vector<16x32xf32>, vector<32x64xf32>, vector<16x64xf32> -> vector<16x64xf32>
    %231 = vector.broadcast %224 : vector<1x64xf32> to vector<16x64xf32>
    %232 = arith.addf %230, %231 : vector<16x64xf32>
    %cst_90 = arith.constant 0.000000e+00 : f32
    %233 = vector.broadcast %cst_90 : f32 to vector<16x64xf32>
    %234 = arith.maximumf %232, %233 : vector<16x64xf32>
    %cst_91 = arith.constant dense<0.000000e+00> : vector<16x32xf32>
    %235 = tpu.matmul %234, %223, %cst_91 {dimension_numbers = #tpu.dot_dimension_numbers<[1], [0], [0], [1], [0, 0, 1, 1], [], []>} : vector<16x64xf32>, vector<64x32xf32>, vector<16x32xf32> -> vector<16x32xf32>
    %236 = vector.broadcast %225 : vector<1x32xf32> to vector<16x32xf32>
    %237 = arith.addf %235, %236 : vector<16x32xf32>
    %238 = arith.addf %221, %237 : vector<16x32xf32>
    %cst_92 = arith.constant dense<0.000000e+00> : vector<16xf32>
    %239 = vector.multi_reduction <add>, %238, %cst_92 [1] : vector<16x32xf32> to vector<16xf32>
    %240 = vector.shape_cast %239 : vector<16xf32> to vector<16x1xf32>
    %cst_93 = arith.constant 3.200000e+01 : f32
    %241 = vector.broadcast %cst_93 : f32 to vector<16x1xf32>
    %242 = arith.divf %240, %241 : vector<16x1xf32>
    %243 = vector.broadcast %242 : vector<16x1xf32> to vector<16x32xf32>
    %244 = arith.subf %238, %243 : vector<16x32xf32>
    %245 = arith.mulf %244, %244 : vector<16x32xf32>
    %cst_94 = arith.constant dense<0.000000e+00> : vector<16xf32>
    %246 = vector.multi_reduction <add>, %245, %cst_94 [1] : vector<16x32xf32> to vector<16xf32>
    %247 = vector.shape_cast %246 : vector<16xf32> to vector<16x1xf32>
    %cst_95 = arith.constant 3.200000e+01 : f32
    %248 = vector.broadcast %cst_95 : f32 to vector<16x1xf32>
    %249 = arith.divf %247, %248 : vector<16x1xf32>
    %250 = vector.broadcast %242 : vector<16x1xf32> to vector<16x32xf32>
    %251 = arith.subf %238, %250 : vector<16x32xf32>
    %cst_96 = arith.constant 9.99999974E-6 : f32
    %252 = vector.broadcast %cst_96 : f32 to vector<16x1xf32>
    %253 = arith.addf %249, %252 : vector<16x1xf32>
    %254 = math.rsqrt %253 : vector<16x1xf32>
    %255 = vector.broadcast %254 : vector<16x1xf32> to vector<16x32xf32>
    %256 = arith.mulf %251, %255 : vector<16x32xf32>
    %257 = vector.broadcast %226 : vector<1x32xf32> to vector<16x32xf32>
    %258 = arith.mulf %256, %257 : vector<16x32xf32>
    %259 = vector.broadcast %227 : vector<1x32xf32> to vector<16x32xf32>
    %260 = arith.addf %258, %259 : vector<16x32xf32>
    %cst_97 = arith.constant dense<0.000000e+00> : vector<16xf32>
    %261 = vector.multi_reduction <add>, %260, %cst_97 [1] : vector<16x32xf32> to vector<16xf32>
    %262 = vector.shape_cast %261 : vector<16xf32> to vector<16x1xf32>
    %cst_98 = arith.constant 3.200000e+01 : f32
    %263 = vector.broadcast %cst_98 : f32 to vector<16x1xf32>
    %264 = arith.divf %262, %263 : vector<16x1xf32>
    %265 = vector.broadcast %264 : vector<16x1xf32> to vector<16x32xf32>
    %266 = arith.subf %260, %265 : vector<16x32xf32>
    %267 = arith.mulf %266, %266 : vector<16x32xf32>
    %cst_99 = arith.constant dense<0.000000e+00> : vector<16xf32>
    %268 = vector.multi_reduction <add>, %267, %cst_99 [1] : vector<16x32xf32> to vector<16xf32>
    %269 = vector.shape_cast %268 : vector<16xf32> to vector<16x1xf32>
    %cst_100 = arith.constant 3.200000e+01 : f32
    %270 = vector.broadcast %cst_100 : f32 to vector<16x1xf32>
    %271 = arith.divf %269, %270 : vector<16x1xf32>
    %272 = vector.broadcast %264 : vector<16x1xf32> to vector<16x32xf32>
    %273 = arith.subf %260, %272 : vector<16x32xf32>
    %cst_101 = arith.constant 9.99999974E-6 : f32
    %274 = vector.broadcast %cst_101 : f32 to vector<16x1xf32>
    %275 = arith.addf %271, %274 : vector<16x1xf32>
    %276 = math.rsqrt %275 : vector<16x1xf32>
    %277 = vector.broadcast %276 : vector<16x1xf32> to vector<16x32xf32>
    %278 = arith.mulf %273, %277 : vector<16x32xf32>
    %279 = vector.broadcast %228 : vector<1x32xf32> to vector<16x32xf32>
    %280 = arith.mulf %278, %279 : vector<16x32xf32>
    %281 = vector.broadcast %229 : vector<1x32xf32> to vector<16x32xf32>
    %282 = arith.addf %280, %281 : vector<16x32xf32>
    %c0_102 = arith.constant 0 : index
    %c0_103 = arith.constant 0 : index
    %283 = vector.load %arg2[%c0_102, %c0_103] : memref<16x32xf32, #tpu.memory_space<vmem>>, vector<16x32xf32>
    tpu.vector_store %arg2[%c0_102, %c0_103], %282 {strides = array<i32>} : memref<16x32xf32, #tpu.memory_space<vmem>>, vector<16x32xf32>,
    return
  }
}

</mosaic_0001>

<bundles_post_ra>
// kernel: generator_forward.1
= control target key start
LH: loop header
LB: loop body
LE: loop exit
PB: predicated region body
PF: predicated region fallthrough
CT: control target
= control target key end

     0   :  { %vm36_vm0 = vcmask 261120   ;;  %vm124_vm1 = vcmask 64512   ;;  %s3112_s21 = smov 120   ;;  %s3114_s22 = smov 88   ;;  %v13_v22 = vlaneseq  ;;  %vm212_vm8 = vcmask 130048   ;;  %s3575_s1 = inlined_call_operand.vmem [shape: f32[168,128], index: 1, kind: input, shape index: {}]   ;;  %s3576_s0 = inlined_call_operand.vmem [shape: f32[16,32], index: 0, kind: input, shape index: {}]   ;;  %s3577_s2 = inlined_call_operand.vmem [shape: f32[16,32], index: 2, kind: output, shape index: {}]  }
   0x1   :  { %v27_v0 = vld [vmem:[%s3575_s1] sm:$0xff]  ;;  %v28_v1 = vld [vmem:[%s3575_s1 + $0x8] sm:$0xff]  ;;  %v29_v2 = vld [vmem:[%s3575_s1 + $0x10] sm:$0xff]  ;;  %s3115_s23 = smov 64   ;;  %s3116_s24 = smov 80   ;;  %vm962_vm10 = vcmask 195584  }
   0x2   :  { %v2781_v3 = vpack.c.bf16 %v28_v1, %v27_v0  ;;  %v30_v4 = vld [vmem:[%s3575_s1 + $0x18] sm:$0xff]  ;;  %v3157_v5 = vld [vmem:[%s3576_s0] sm:$0xff]  ;;  %v3164_v7 = vld [vmem:[%s3576_s0 + $0x8] sm:$0xff]  ;;  %s3113_s0 = smov 96   ;;  %v14_v23 = vshrl.u32 %v13_v22, 7  ;;  %v17_v25 = vand.u32 127, %v13_v22 }
   0x3   :  { %v2785_v6 = vpack.c.bf16 %v30_v4, %v29_v2  ;;  %2603 = vmatprep.mubr.msk.f32.mxu1 %vm36_vm0, %v3157_v5  ;;  %vm3188_vm2 = vmpackc.low %vm124_vm1, %vm124_vm1  ;;  %s3117_s25 = smov 56   ;;  %s3118_s26 = smov 112   ;;  %vm2264_vm11 = vcmask 523264  }
   0x4   :  { %2782 = vmatprep.subr.bf16.mxu1 %v2781_v3  ;;  %v15_v24 = vadd.s32 8, %v14_v23  ;;  %v22_v27 = vshra.s32 %v17_v25, 3  ;;  %v20_v28 = vshra.s32 %v14_v23, 3  ;;  %vm18_vm5 = vcmp.le.s32.totalorder %v17_v25, %v14_v23  ;;  %s3119_s27 = smov 72   ;;  %s3120_s28 = smov 104  }
   0x5   :  { %2784 = vmatpush3.bf16.msra.mxu1 %v2781_v3  ;;  %s3121_s29 = smov 48   ;;  %s3122_s30 = smov 8  }
   0x6   :  { %2786 = vmatprep.subr.bf16.mxu1 %v2785_v6  ;;  %v21_v26 = vshra.s32 %v15_v24, 3  ;;  %vm19_vm3 = vcmp.le.s32.totalorder %v17_v25, %v15_v24  ;;  %vm23_vm6 = vcmp.eq.s32.totalorder %v20_v28, %v22_v27  ;;  %s3123_s3 = smov 40   ;;  %s3124_s4 = smov 16  }
   0x7   :  { %vm3208_vm9 = vmand %vm18_vm5, %vm23_vm6  ;;  %s3125_s13 = smov 24  }
   0x8   :  { %vm24_vm4 = vcmp.eq.s32.totalorder %v21_v26, %v22_v27 }
   0x9   :  { %2788 = vmatpush3.bf16.msra.mxu1 %v2785_v6  ;;  %vm3204_vm7 = vmand %vm19_vm3, %vm24_vm4 }
   0xc   :  { %2604 = vmatmul.mubr.msk.f32.vlgmr.msra.gmra.mrb[0].mxu1 %vm36_vm0, %v3164_v7 }
  0xdf   :  { %v3168_v8 = vpop.f32.mrb[0].mxu1 }
  0xe0   :  { %v3170_v9 = vpop.f32.mrb[1].mxu1 }
  0xe1   :  { %322 = vrot.lane.b32.xlu1 %v3170_v9, %s3112_s21  ;;  %2610 = vmatprep.mubr.msk.f32.mxu1 %vm124_vm1, %v3170_v9  ;;  %v3178_v10 = vpack.i.bf16 %v3168_v8, %v3170_v9 }
  0xe3   :  { %2933 = vrot.lane.b32.xlu0 %v3178_v10, %s3113_s0 }
  0xe5   :  { %324 = vrot.lane.b32.xlu1 %v3168_v8, %s3112_s21 }
  0xe7   :  { %2938 = vrot.lane.b32.xlu0 %v3178_v10, %s3114_s22 }
 0x153   :  { %v323_v20 = vpop.permute.xlu1 %322 }
 0x155   :  { %v2934_v11 = vpop.permute.xlu0 %2933 }
 0x156   :  { %v2936_v12 = vunpack.i.h.bf16 %v2934_v11  ;;  %v2935_v13 = vunpack.i.l.bf16 %v2934_v11 }
 0x157   :  { %v325_v21 = vpop.permute.xlu1 %324 }
 0x158   :  { %v2789_v15 = vpack.c.bf16 %v2936_v12, %v2935_v13 }
 0x159   :  { %v2939_v16 = vpop.permute.xlu0 %2938 }
 0x15a   :  { %v2941_v17 = vunpack.i.h.bf16 %v2939_v16  ;;  %v2940_v18 = vunpack.i.l.bf16 %v2939_v16  ;;  %2791 = vmatprep.subr.msk.bf16.mxu1 %vm3188_vm2, %v2789_v15 }
 0x15b   :  { %2794 = vmatpush3.bf16.xpose.msk.msra.mxu1 %vm3188_vm2, %v2789_v15 }
 0x15c   :  { %v2799_v19 = vpack.c.bf16 %v2941_v17, %v2940_v18 }
 0x15e   :  { %2801 = vmatprep.subr.msk.bf16.mxu1 %vm3188_vm2, %v2799_v19 }
 0x162   :  { %2611 = vmatmul.mubr.msk.f32.vlgmr.msra.gmra.mrb[2].mxu1 %vm124_vm1, %v3168_v8 }
 0x163   :  { %2804 = vmatpush3.bf16.xpose.msk.msra.mxu1 %vm3188_vm2, %v2799_v19  ;;  %2624 = vmatprep.mubr.msk.f32.mxu1 %vm124_vm1, %v323_v20 }
 0x16a   :  { %2625 = vmatmul.mubr.msk.f32.vlgmr.msra.gmra.mrb[4].mxu1 %vm124_vm1, %v325_v21 }
 0x235   :  { %v2612_v29 = vpop.f32.mrb[2].mxu1 }
 0x236   :  { %v209_v31 = vmul.f32 0.35355338, %v2612_v29  ;;  %v199_v32 = vpop.f32.mrb[3].mxu1 }
 0x237   :  { %v208_v34 = vmul.f32 0.35355338, %v199_v32 }
 0x238   :  { %v211_v35 = vsel %vm3204_vm7, %v209_v31, -1e+30 }
 0x239   :  { %v216_v36 = vsel %vm212_vm8, %v211_v35, -inf  ;;  %v210_v37 = vsel %vm3208_vm9, %v208_v34, -1e+30 }
 0x23a   :  { %217 = vmax.xlane.f32.xlu1 %v216_v36  ;;  %v213_v38 = vsel %vm212_vm8, %v210_v37, -inf }
 0x23b   :  { %214 = vmax.xlane.f32.xlu0 %v213_v38 }
 0x23d   :  { %v2626_v39 = vpop.f32.mrb[4].mxu1 }
 0x23e   :  { %v404_v40 = vpop.f32.mrb[5].mxu1  ;;  %v414_v41 = vmul.f32 0.35355338, %v2626_v39 }
 0x23f   :  { %v413_v42 = vmul.f32 0.35355338, %v404_v40 }
 0x240   :  { %v416_v45 = vsel %vm3204_vm7, %v414_v41, -1e+30 }
 0x241   :  { %v415_v43 = vsel %vm3208_vm9, %v413_v42, -1e+30  ;;  %v420_v46 = vsel %vm212_vm8, %v416_v45, -inf }
 0x242   :  { %v417_v44 = vsel %vm212_vm8, %v415_v43, -inf }
 0x243   :  { %418 = vmax.xlane.f32.xlu0 %v417_v44 }
 0x247   :  { %421 = vmax.xlane.f32.xlu0 %v420_v46 }
 0x24b   :  { %2943 = vrot.lane.b32.xlu1 %v3178_v10, %s3115_s23 }
 0x2c7   :  { %v218_v47 = vpop.xlane.xlu1 %217 }
 0x2c8   :  { %v220_v48 = vsub.f32 %v211_v35, %v218_v47  ;;  %v215_v49 = vpop.xlane.xlu0 %214 }
 0x2c9   :  { %v219_v50 = vsub.f32 %v210_v37, %v215_v49 }
 0x2ca   :  { %v223_v51 = vmul.f32 1.442695, %v220_v48 }
 0x2cb   :  { %v221_v52 = vmul.f32 1.442695, %v219_v50  ;;  %v2944_v53 = vpop.permute.xlu1 %2943 }
 0x2cc   :  { %3032 = vpow2.f32 %v223_v51  ;;  %v2946_v54 = vunpack.i.h.bf16 %v2944_v53  ;;  %v2945_v55 = vunpack.i.l.bf16 %v2944_v53 }
 0x2cd   :  { %3034 = vpow2.f32 %v221_v52 }
 0x2ce   :  { %v2795_v56 = vpack.c.bf16 %v2946_v54, %v2945_v55 }
 0x2d0   :  { %2796 = vmatprep.subr.bf16.mxu0 %v2795_v56  ;;  %v419_v57 = vpop.xlane.xlu0 %418 }
 0x2d1   :  { %2798 = vmatpush3.bf16.msra.mxu0 %v2795_v56  ;;  %v423_v3 = vsub.f32 %v415_v43, %v419_v57 }
 0x2d3   :  { %v425_v4 = vmul.f32 1.442695, %v423_v3 }
 0x2d4   :  { %v422_v58 = vpop.xlane.xlu0 %421 }
 0x2d5   :  { %v424_v59 = vsub.f32 %v416_v45, %v422_v58 }
 0x2d6   :  { %v3033_v60 = vpop.eup %3032 }
 0x2d7   :  { %v3035_v61 = vpop.eup %3034  ;;  %v427_v62 = vmul.f32 1.442695, %v424_v59  ;;  %v228_v63 = vsel %vm212_vm8, %v3033_v60, 0.0 }
 0x2d8   :  { %229 = vadd.xlane.f32.xlu0 %v228_v63  ;;  %v225_v0 = vsel %vm212_vm8, %v3035_v61, 0.0 }
 0x2d9   :  { %3036 = vpow2.f32 %v427_v62  ;;  %226 = vadd.xlane.f32.xlu1 %v225_v0 }
 0x2da   :  { %3038 = vpow2.f32 %v425_v4 }
 0x2e3   :  { %v3037_v1 = vpop.eup %3036 }
 0x2e4   :  { %v432_v2 = vsel %vm212_vm8, %v3037_v1, 0.0  ;;  %v3039_v6 = vpop.eup %3038 }
 0x2e5   :  { %433 = vadd.xlane.f32.xlu0 %v432_v2  ;;  %v429_v11 = vsel %vm212_vm8, %v3039_v6, 0.0 }
 0x2ea   :  { %2953 = vrot.lane.b32.xlu1 %v3178_v10, %s3116_s24 }
 0x2fb   :  { %2948 = vrot.lane.b32.xlu0 %v3178_v10, %s3117_s25 }
 0x2ff   :  { %528 = vrot.lane.b32.xlu0 %v3168_v8, %s3118_s26 }
 0x30e   :  { %430 = vadd.xlane.f32.xlu1 %v429_v11 }
 0x31f   :  { %526 = vrot.lane.b32.xlu1 %v3170_v9, %s3118_s26 }
 0x365   :  { %v230_v12 = vpop.xlane.xlu0 %229 }
 0x366   :  { %3040 = vrcp.f32 %v230_v12  ;;  %v227_v13 = vpop.xlane.xlu1 %226 }
 0x367   :  { %3042 = vrcp.f32 %v227_v13 }
 0x36a   :  { %v2954_v20 = vpop.permute.xlu1 %2953 }
 0x36b   :  { %v2956_v22 = vunpack.i.h.bf16 %v2954_v20  ;;  %v2955_v23 = vunpack.i.l.bf16 %v2954_v20 }
 0x36d   :  { %v2809_v27 = vpack.c.bf16 %v2956_v22, %v2955_v23 }
 0x370   :  { %v3041_v15 = vpop.eup %3040 }
 0x371   :  { %v3043_v16 = vpop.eup %3042  ;;  %v234_v19 = vmul.f32 %v3041_v15, %v3033_v60 }
 0x372   :  { %v434_v17 = vpop.xlane.xlu0 %433  ;;  %v233_v18 = vmul.f32 %v3043_v16, %v3035_v61 }
 0x373   :  { %3044 = vrcp.f32 %v434_v17 }
 0x374   :  { %2617 = vmatprep.mubr.msk.f32.mxu0 %vm212_vm8, %v233_v18 }
 0x375   :  { %2618 = vmatmul.mubr.msk.f32.vlgmr.msra.gmra.mrb[0].mxu0 %vm212_vm8, %v234_v19 }
 0x376   :  { %v2949_v21 = vpop.permute.xlu0 %2948 }
 0x377   :  { %v2951_v24 = vunpack.i.h.bf16 %v2949_v21  ;;  %v2950_v25 = vunpack.i.l.bf16 %v2949_v21 }
 0x379   :  { %v2805_v26 = vpack.c.bf16 %v2951_v24, %v2950_v25 }
 0x37a   :  { %v529_v36 = vpop.permute.xlu0 %528 }
 0x37b   :  { %2806 = vmatprep.subr.bf16.mxu0 %v2805_v26 }
 0x37c   :  { %2808 = vmatpush3.bf16.msra.mxu0 %v2805_v26 }
 0x37d   :  { %2811 = vmatprep.subr.msk.bf16.mxu0 %vm3188_vm2, %v2809_v27  ;;  %v3045_v29 = vpop.eup %3044 }
 0x37e   :  { %v438_v34 = vmul.f32 %v3045_v29, %v3037_v1 }
 0x39b   :  { %v431_v28 = vpop.xlane.xlu1 %430 }
 0x39c   :  { %3046 = vrcp.f32 %v431_v28 }
 0x39f   :  { %v527_v35 = vpop.permute.xlu1 %526 }
 0x3a6   :  { %v3047_v31 = vpop.eup %3046 }
 0x3a7   :  { %v437_v32 = vmul.f32 %v3047_v31, %v3039_v6 }
 0x3a9   :  { %2631 = vmatprep.mubr.msk.f32.mxu0 %vm212_vm8, %v437_v32 }
 0x3aa   :  { %2632 = vmatmul.mubr.msk.f32.vlgmr.msra.gmra.mrb[2].mxu0 %vm212_vm8, %v438_v34 }
 0x3ab   :  { %2814 = vmatpush3.bf16.xpose.msk.msra.mxu0 %vm3188_vm2, %v2809_v27  ;;  %2638 = vmatprep.mubr.msk.f32.mxu0 %vm124_vm1, %v527_v35 }
 0x3b2   :  { %2639 = vmatmul.mubr.msk.f32.vlgmr.msra.gmra.mrb[4].mxu0 %vm124_vm1, %v529_v36 }
 0x448   :  { %v3248_v37 = vpop.f32.mrb[0].mxu0 }
 0x449   :  { %v3250_v38 = vpop.f32.mrb[1].mxu0 }
 0x47d   :  { %v3252_v39 = vpop.f32.mrb[2].mxu0 }
 0x47e   :  { %v3254_v40 = vpop.f32.mrb[3].mxu0 }
 0x485   :  { %v2640_v41 = vpop.f32.mrb[4].mxu0 }
 0x486   :  { %v618_v42 = vmul.f32 0.35355338, %v2640_v41  ;;  %v608_v43 = vpop.f32.mrb[5].mxu0 }
 0x487   :  { %v617_v44 = vmul.f32 0.35355338, %v608_v43 }
 0x488   :  { %v620_v45 = vsel %vm3204_vm7, %v618_v42, -1e+30 }
 0x489   :  { %v624_v46 = vsel %vm212_vm8, %v620_v45, -inf  ;;  %v619_v47 = vsel %vm3208_vm9, %v617_v44, -1e+30 }
 0x48a   :  { %625 = vmax.xlane.f32.xlu0 %v624_v46  ;;  %v621_v48 = vsel %vm212_vm8, %v619_v47, -inf }
 0x48b   :  { %622 = vmax.xlane.f32.xlu1 %v621_v48 }
 0x517   :  { %v626_v49 = vpop.xlane.xlu0 %625 }
 0x518   :  { %v628_v50 = vsub.f32 %v620_v45, %v626_v49  ;;  %v623_v51 = vpop.xlane.xlu1 %622  ;;  %v3306_v49 = vld [vmem:[%s3575_s1 + $0x48] sm:$0xff] }
 0x519   :  { %v627_v52 = vsub.f32 %v619_v47, %v623_v51 }
 0x51a   :  { %v631_v53 = vmul.f32 1.442695, %v628_v50  ;;  %v3311_v50 = vld [vmem:[%s3575_s1 + $0x50] sm:$0xff] }
 0x51b   :  { %v629_v54 = vmul.f32 1.442695, %v627_v52  ;;  %v3318_v52 = vld [vmem:[%s3575_s1 + $0x58] sm:$0xff] }
 0x51c   :  { %3048 = vpow2.f32 %v631_v53  ;;  %v2833_v53 = vpack.c.bf16 %v3318_v52, %v3311_v50 }
 0x51d   :  { %3050 = vpow2.f32 %v629_v54 }
 0x526   :  { %v3049_v55 = vpop.eup %3048 }
 0x527   :  { %v3051_v56 = vpop.eup %3050  ;;  %v636_v57 = vsel %vm212_vm8, %v3049_v55, 0.0 }
 0x528   :  { %637 = vadd.xlane.f32.xlu1 %v636_v57  ;;  %v633_v58 = vsel %vm212_vm8, %v3051_v56, 0.0 }
 0x529   :  { %634 = vadd.xlane.f32.xlu0 %v633_v58 }
 0x539   :  { %2963 = vrot.lane.b32.xlu1 %v3178_v10, %s3119_s27 }
 0x53d   :  { %730 = vrot.lane.b32.xlu1 %v3170_v9, %s3120_s28 }
 0x53f   :  { %2958 = vrot.lane.b32.xlu0 %v3178_v10, %s3121_s29 }
 0x543   :  { %732 = vrot.lane.b32.xlu0 %v3168_v8, %s3120_s28 }
 0x5b5   :  { %v638_v59 = vpop.xlane.xlu1 %637 }
 0x5b6   :  { %3052 = vrcp.f32 %v638_v59  ;;  %v635_v60 = vpop.xlane.xlu0 %634 }
 0x5b7   :  { %3054 = vrcp.f32 %v635_v60 }
 0x5b9   :  { %v2964_v61 = vpop.permute.xlu1 %2963 }
 0x5ba   :  { %v2959_v62 = vpop.permute.xlu0 %2958  ;;  %v2966_v63 = vunpack.i.h.bf16 %v2964_v61  ;;  %v2965_v0 = vunpack.i.l.bf16 %v2964_v61 }
 0x5bb   :  { %v2961_v1 = vunpack.i.h.bf16 %v2959_v62  ;;  %v2960_v2 = vunpack.i.l.bf16 %v2959_v62 }
 0x5bc   :  { %v2819_v4 = vpack.c.bf16 %v2966_v63, %v2965_v0 }
 0x5bd   :  { %v2815_v3 = vpack.c.bf16 %v2961_v1, %v2960_v2  ;;  %v731_v12 = vpop.permute.xlu1 %730 }
 0x5be   :  { %v733_v13 = vpop.permute.xlu0 %732 }
 0x5bf   :  { %2816 = vmatprep.subr.bf16.mxu1 %v2815_v3 }
 0x5c0   :  { %v3053_v9 = vpop.eup %3052  ;;  %2818 = vmatpush3.bf16.msra.mxu1 %v2815_v3 }
 0x5c1   :  { %v3055_v6 = vpop.eup %3054  ;;  %2821 = vmatprep.subr.msk.bf16.mxu1 %vm3188_vm2, %v2819_v4  ;;  %v642_v11 = vmul.f32 %v3053_v9, %v3049_v55 }
 0x5c2   :  { %v641_v8 = vmul.f32 %v3055_v6, %v3051_v56 }
 0x5c4   :  { %2645 = vmatprep.mubr.msk.f32.mxu1 %vm212_vm8, %v641_v8 }
 0x5c5   :  { %2646 = vmatmul.mubr.msk.f32.vlgmr.msra.gmra.mrb[6].mxu1 %vm212_vm8, %v642_v11  ;;  %v3341_v11 = vld [vmem:[%s3575_s1 + $0xa0] ss:$0 sm:$0xff] }
 0x5c6   :  { %2652 = vmatprep.mubr.msk.f32.mxu1 %vm124_vm1, %v731_v12 }
 0x5c9   :  { %2824 = vmatpush3.bf16.xpose.msk.msra.mxu1 %vm3188_vm2, %v2819_v4 }
 0x5d0   :  { %2653 = vmatmul.mubr.msk.f32.vlgmr.msra.gmra.mrb[8].mxu1 %vm124_vm1, %v733_v13 }
 0x698   :  { %v2647_v15 = vpop.f32.mrb[6].mxu1 }
 0x699   :  { %v721_v16 = vpop.f32.mrb[7].mxu1 }
 0x6a3   :  { %v2654_v17 = vpop.f32.mrb[8].mxu1 }
 0x6a4   :  { %v822_v18 = vmul.f32 0.35355338, %v2654_v17  ;;  %v812_v19 = vpop.f32.mrb[9].mxu1 }
 0x6a5   :  { %v821_v20 = vmul.f32 0.35355338, %v812_v19 }
 0x6a6   :  { %v824_v21 = vsel %vm3204_vm7, %v822_v18, -1e+30 }
 0x6a7   :  { %v828_v22 = vsel %vm212_vm8, %v824_v21, -inf  ;;  %v823_v23 = vsel %vm3208_vm9, %v821_v20, -1e+30 }
 0x6a8   :  { %829 = vmax.xlane.f32.xlu0 %v828_v22  ;;  %v825_v24 = vsel %vm212_vm8, %v823_v23, -inf  ;;  %v1088_v22 = vld [vmem:[%s3575_s1 + $0x28] sm:$0xff] }
 0x6a9   :  { %826 = vmax.xlane.f32.xlu1 %v825_v24  ;;  %v1089_v24 = vld [vmem:[%s3575_s1 + $0x30] sm:$0xff] }
 0x735   :  { %v830_v25 = vpop.xlane.xlu0 %829 }
 0x736   :  { %v832_v26 = vsub.f32 %v824_v21, %v830_v25  ;;  %v827_v27 = vpop.xlane.xlu1 %826  ;;  %v1087_v21 = vld [vmem:[%s3575_s1 + $0x20] sm:$0xff]  ;;  %v1090_v25 = vld [vmem:[%s3575_s1 + $0x38] sm:$0xff] }
 0x737   :  { %v831_v28 = vsub.f32 %v823_v23, %v827_v27  ;;  %v2837_v23 = vpack.c.bf16 %v1088_v22, %v1087_v21 }
 0x738   :  { %v835_v29 = vmul.f32 1.442695, %v832_v26  ;;  %v2841_v26 = vpack.c.bf16 %v1090_v25, %v1089_v24 }
 0x739   :  { %v833_v31 = vmul.f32 1.442695, %v831_v28  ;;  %2838 = vmatprep.subr.bf16.mxu1 %v2837_v23 }
 0x73a   :  { %3056 = vpow2.f32 %v835_v29  ;;  %2840 = vmatpush3.bf16.msra.mxu1 %v2837_v23 }
 0x73b   :  { %3058 = vpow2.f32 %v833_v31  ;;  %2842 = vmatprep.subr.bf16.mxu1 %v2841_v26 }
 0x73e   :  { %2844 = vmatpush3.bf16.msra.mxu1 %v2841_v26 }
 0x744   :  { %v3057_v32 = vpop.eup %3056 }
 0x745   :  { %v3059_v34 = vpop.eup %3058  ;;  %v840_v35 = vsel %vm212_vm8, %v3057_v32, 0.0 }
 0x746   :  { %841 = vadd.xlane.f32.xlu1 %v840_v35  ;;  %v837_v36 = vsel %vm212_vm8, %v3059_v34, 0.0 }
 0x747   :  { %838 = vadd.xlane.f32.xlu0 %v837_v36 }
 0x757   :  { %936 = vrot.lane.b32.xlu1 %v3254_v40, %s3122_s30 }
 0x75b   :  { %938 = vrot.lane.b32.xlu1 %v3252_v39, %s3122_s30 }
 0x75d   :  { %2968 = vrot.lane.b32.xlu0 %v3178_v10, %s3123_s3  ;;  %v3301_v10 = vld [vmem:[%s3575_s1 + $0x40] sm:$0xff] }
 0x75e   :  { %v2829_v51 = vpack.c.bf16 %v3306_v49, %v3301_v10 }
 0x75f   :  { %946 = vrot.lane.b32.xlu1 %v2647_v15, %s3124_s4 }
 0x761   :  { %944 = vrot.lane.b32.xlu0 %v721_v16, %s3124_s4 }
 0x7d3   :  { %v842_v41 = vpop.xlane.xlu1 %841 }
 0x7d4   :  { %3060 = vrcp.f32 %v842_v41  ;;  %v839_v42 = vpop.xlane.xlu0 %838 }
 0x7d5   :  { %3062 = vrcp.f32 %v839_v42 }
 0x7d7   :  { %v937_v56 = vpop.permute.xlu1 %936 }
 0x7d8   :  { %v2969_v43 = vpop.permute.xlu0 %2968  ;;  %v958_v60 = vsel %vm124_vm1, %v3250_v38, %v937_v56 }
 0x7d9   :  { %v2971_v44 = vunpack.i.h.bf16 %v2969_v43  ;;  %v2970_v45 = vunpack.i.l.bf16 %v2969_v43 }
 0x7db   :  { %v2825_v40 = vpack.c.bf16 %v2971_v44, %v2970_v45  ;;  %v939_v57 = vpop.permute.xlu1 %938 }
 0x7dc   :  { %v945_v59 = vpop.permute.xlu0 %944  ;;  %v959_v62 = vsel %vm124_vm1, %v3248_v37, %v939_v57 }
 0x7dd   :  { %2826 = vmatprep.subr.bf16.mxu0 %v2825_v40  ;;  %v960_v63 = vsel %vm212_vm8, %v958_v60, %v945_v59 }
 0x7de   :  { %v3061_v46 = vpop.eup %3060  ;;  %2828 = vmatpush3.bf16.msra.mxu0 %v2825_v40 }
 0x7df   :  { %v3063_v39 = vpop.eup %3062  ;;  %v846_v48 = vmul.f32 %v3061_v46, %v3057_v32  ;;  %2830 = vmatprep.subr.bf16.mxu0 %v2829_v51  ;;  %v947_v58 = vpop.permute.xlu1 %946 }
 0x7e0   :  { %v845_v47 = vmul.f32 %v3063_v39, %v3059_v34  ;;  %v961_v1 = vsel %vm212_vm8, %v959_v62, %v947_v58 }
 0x7e2   :  { %2659 = vmatprep.mubr.msk.f32.mxu0 %vm212_vm8, %v845_v47 }
 0x7e3   :  { %2660 = vmatmul.mubr.msk.f32.vlgmr.msra.gmra.mrb[6].mxu0 %vm212_vm8, %v846_v48 }
 0x7e4   :  { %2832 = vmatpush3.bf16.msra.mxu0 %v2829_v51 }
 0x7e5   :  { %2834 = vmatprep.subr.bf16.mxu0 %v2833_v53 }
 0x7e8   :  { %2836 = vmatpush3.bf16.msra.mxu0 %v2833_v53 }
 0x8b6   :  { %v2661_v54 = vpop.f32.mrb[6].mxu0 }
 0x8b7   :  { %954 = vrot.lane.b32.xlu1 %v2661_v54, %s3125_s13  ;;  %v925_v55 = vpop.f32.mrb[7].mxu0 }
 0x8b8   :  { %952 = vrot.lane.b32.xlu0 %v925_v55, %s3125_s13 }
 0x929   :  { %v955_v61 = vpop.permute.xlu1 %954 }
 0x92a   :  { %v953_v0 = vpop.permute.xlu0 %952  ;;  %v964_v3 = vsel %vm962_vm10, %v961_v1, %v955_v61 }
 0x92b   :  { %v963_v2 = vsel %vm962_vm10, %v960_v63, %v953_v0 }
 0x92c   :  { %2670 = vmatprep.mubr.msk.f32.mxu0 %vm36_vm0, %v963_v2 }
 0x92d   :  { %2671 = vmatmul.mubr.msk.f32.vlgmr.msra.gmra.mrb[8].mxu0 %vm36_vm0, %v964_v3 }
 0xa00   :  { %v2672_v4 = vpop.f32.mrb[8].mxu0 }
 0xa01   :  { %v1047_v38 = vadd.f32 %v2672_v4, %v3164_v7  ;;  %v1037_v9 = vpop.f32.mrb[9].mxu0 }
 0xa02   :  { %v1046_v6 = vadd.f32 %v1037_v9, %v3157_v5 }
 0xa03   :  { %v1051_v37 = vsel %vm36_vm0, %v1047_v38, 0.0 }
 0xa04   :  { %1052 = vadd.xlane.f32.xlu1 %v1051_v37  ;;  %v1048_v8 = vsel %vm36_vm0, %v1046_v6, 0.0 }
 0xa05   :  { %1049 = vadd.xlane.f32.xlu0 %v1048_v8 }
 0xa15   :  { %1082 = vrot.lane.b32.xlu1 %v3341_v11, %s3113_s0 }
 0xa91   :  { %v1053_v12 = vpop.xlane.xlu1 %1052 }
 0xa92   :  { %v1056_v13 = vmul.f32 0.03125, %v1053_v12  ;;  %v1050_v7 = vpop.xlane.xlu0 %1049 }
 0xa93   :  { %v1055_v15 = vmul.f32 0.03125, %v1050_v7 }
 0xa94   :  { %v1058_v16 = vsub.f32 %v1047_v38, %v1056_v13 }
 0xa95   :  { %v1057_v5 = vsub.f32 %v1046_v6, %v1055_v15  ;;  %v1083_v41 = vpop.permute.xlu1 %1082 }
 0xa96   :  { %v1060_v19 = vmul.f32 %v1058_v16, %v1058_v16 }
 0xa97   :  { %v1059_v17 = vmul.f32 %v1057_v5, %v1057_v5 }
 0xa98   :  { %v1064_v20 = vsel %vm36_vm0, %v1060_v19, 0.0 }
 0xa99   :  { %v1061_v18 = vsel %vm36_vm0, %v1059_v17, 0.0 }
 0xa9a   :  { %1062 = vadd.xlane.f32.xlu0 %v1061_v18 }
 0xa9e   :  { %1065 = vadd.xlane.f32.xlu0 %v1064_v20 }
 0xb27   :  { %v1063_v27 = vpop.xlane.xlu0 %1062 }
 0xb28   :  { %v1067_v28 = vmul.f32 0.03125, %v1063_v27 }
 0xb2a   :  { %v1069_v29 = vadd.f32 1e-05, %v1067_v28 }
 0xb2b   :  { %v1066_v31 = vpop.xlane.xlu0 %1065 }
 0xb2c   :  { %3064 = vrsqrt.f32 %v1069_v29  ;;  %v1068_v32 = vmul.f32 0.03125, %v1066_v31 }
 0xb2e   :  { %v1070_v34 = vadd.f32 1e-05, %v1068_v32 }
 0xb30   :  { %3066 = vrsqrt.f32 %v1070_v34 }
 0xb36   :  { %v3065_v35 = vpop.eup %3064 }
 0xb37   :  { %v1073_v36 = vmul.f32 %v3065_v35, %v1057_v5 }
 0xb39   :  { %v1079_v42 = vmul.f32 %v3341_v11, %v1073_v36 }
 0xb3a   :  { %v3067_v43 = vpop.eup %3066 }
 0xb3b   :  { %v1074_v44 = vmul.f32 %v3067_v43, %v1058_v16  ;;  %v3360_v45 = vadd.f32 %v1083_v41, %v1079_v42 }
 0xb3d   :  { %v1080_v40 = vmul.f32 %v3341_v11, %v1074_v44  ;;  %2681 = vmatprep.mubr.msk.f32.mxu1 %vm36_vm0, %v3360_v45 }
 0xb3f   :  { %v3365_v46 = vadd.f32 %v1083_v41, %v1080_v40 }
 0xb41   :  { %2682 = vmatmul.mubr.msk.f32.vlgmr.msra.gmra.mrb[10].mxu1 %vm36_vm0, %v3365_v46 }
 0xc14   :  { %v3369_v39 = vpop.f32.mrb[10].mxu1 }
 0xc15   :  { %v3371_v47 = vpop.f32.mrb[11].mxu1 }
 0xc16   :  { %2688 = vmatprep.mubr.msk.f32.mxu0 %vm124_vm1, %v3371_v47  ;;  %v3377_v48 = vpack.i.bf16 %v3369_v39, %v3371_v47 }
 0xc18   :  { %2973 = vrot.lane.b32.xlu0 %v3377_v48, %s3113_s0 }
 0xc8a   :  { %v2974_v51 = vpop.permute.xlu0 %2973 }
 0xc8b   :  { %v2976_v53 = vunpack.i.h.bf16 %v2974_v51  ;;  %v2975_v54 = vunpack.i.l.bf16 %v2974_v51 }
 0xc8d   :  { %v2845_v55 = vpack.c.bf16 %v2976_v53, %v2975_v54 }
 0xc8f   :  { %2847 = vmatprep.subr.msk.bf16.mxu0 %vm3188_vm2, %v2845_v55 }
 0xc90   :  { %2850 = vmatpush3.bf16.xpose.msk.msra.mxu0 %vm3188_vm2, %v2845_v55 }
 0xc97   :  { %2689 = vmatmul.mubr.msk.f32.vlgmr.msra.gmra.mrb[10].mxu0 %vm124_vm1, %v3369_v39 }
 0xd6a   :  { %v2690_v56 = vpop.f32.mrb[10].mxu0 }
 0xd6b   :  { %v1262_v57 = vmul.f32 0.35355338, %v2690_v56  ;;  %v1252_v58 = vpop.f32.mrb[11].mxu0 }
 0xd6c   :  { %v1261_v59 = vmul.f32 0.35355338, %v1252_v58 }
 0xd6d   :  { %v1264_v60 = vsel %vm3204_vm7, %v1262_v57, -1e+30 }
 0xd6e   :  { %v1268_v61 = vsel %vm212_vm8, %v1264_v60, -inf  ;;  %v1263_v62 = vsel %vm3208_vm9, %v1261_v59, -1e+30 }
 0xd6f   :  { %1269 = vmax.xlane.f32.xlu0 %v1268_v61  ;;  %v1265_v63 = vsel %vm212_vm8, %v1263_v62, -inf }
 0xd70   :  { %1266 = vmax.xlane.f32.xlu1 %v1265_v63 }
 0xd81   :  { %2978 = vrot.lane.b32.xlu1 %v3377_v48, %s3115_s23 }
 0xd85   :  { %1374 = vrot.lane.b32.xlu1 %v3371_v47, %s3112_s21 }
 0xdfc   :  { %v1270_v0 = vpop.xlane.xlu0 %1269 }
 0xdfd   :  { %v1272_v1 = vsub.f32 %v1264_v60, %v1270_v0  ;;  %v1267_v2 = vpop.xlane.xlu1 %1266 }
 0xdfe   :  { %v1271_v3 = vsub.f32 %v1263_v62, %v1267_v2 }
 0xdff   :  { %v1275_v4 = vmul.f32 1.442695, %v1272_v1 }
 0xe00   :  { %v1273_v38 = vmul.f32 1.442695, %v1271_v3 }
 0xe01   :  { %3068 = vpow2.f32 %v1275_v4  ;;  %v2979_v9 = vpop.permute.xlu1 %2978 }
 0xe02   :  { %3070 = vpow2.f32 %v1273_v38  ;;  %v2981_v6 = vunpack.i.h.bf16 %v2979_v9  ;;  %v2980_v37 = vunpack.i.l.bf16 %v2979_v9 }
 0xe04   :  { %v2851_v8 = vpack.c.bf16 %v2981_v6, %v2980_v37 }
 0xe05   :  { %v1375_v16 = vpop.permute.xlu1 %1374 }
 0xe06   :  { %2852 = vmatprep.subr.bf16.mxu1 %v2851_v8 }
 0xe07   :  { %2854 = vmatpush3.bf16.msra.mxu1 %v2851_v8 }
 0xe0b   :  { %v3069_v12 = vpop.eup %3068 }
 0xe0c   :  { %v3071_v13 = vpop.eup %3070  ;;  %v1280_v7 = vsel %vm212_vm8, %v3069_v12, 0.0 }
 0xe0d   :  { %1281 = vadd.xlane.f32.xlu0 %v1280_v7  ;;  %v1277_v15 = vsel %vm212_vm8, %v3071_v13, 0.0 }
 0xe0e   :  { %1278 = vadd.xlane.f32.xlu1 %v1277_v15 }
 0xe1f   :  { %1376 = vrot.lane.b32.xlu1 %v3369_v39, %s3112_s21  ;;  %s3126_s21 = smov 32  }
 0xe23   :  { %2983 = vrot.lane.b32.xlu0 %v3377_v48, %s3114_s22 }
 0xe9a   :  { %v1282_v5 = vpop.xlane.xlu0 %1281 }
 0xe9b   :  { %3072 = vrcp.f32 %v1282_v5  ;;  %v1279_v17 = vpop.xlane.xlu1 %1278 }
 0xe9c   :  { %3074 = vrcp.f32 %v1279_v17 }
 0xe9e   :  { %v2984_v18 = vpop.permute.xlu0 %2983 }
 0xe9f   :  { %v2986_v19 = vunpack.i.h.bf16 %v2984_v18  ;;  %v2985_v20 = vunpack.i.l.bf16 %v2984_v18  ;;  %v1377_v26 = vpop.permute.xlu1 %1376 }
 0xea1   :  { %v2855_v21 = vpack.c.bf16 %v2986_v19, %v2985_v20 }
 0xea3   :  { %2857 = vmatprep.subr.msk.bf16.mxu1 %vm3188_vm2, %v2855_v21 }
 0xea5   :  { %v3073_v22 = vpop.eup %3072 }
 0xea6   :  { %v3075_v23 = vpop.eup %3074  ;;  %v1286_v25 = vmul.f32 %v3073_v22, %v3069_v12 }
 0xea7   :  { %v1285_v24 = vmul.f32 %v3075_v23, %v3071_v13 }
 0xea9   :  { %2695 = vmatprep.mubr.msk.f32.mxu1 %vm212_vm8, %v1285_v24 }
 0xeaa   :  { %2696 = vmatmul.mubr.msk.f32.vlgmr.msra.gmra.mrb[12].mxu1 %vm212_vm8, %v1286_v25 }
 0xeab   :  { %2860 = vmatpush3.bf16.xpose.msk.msra.mxu1 %vm3188_vm2, %v2855_v21  ;;  %2702 = vmatprep.mubr.msk.f32.mxu1 %vm124_vm1, %v1375_v16 }
 0xeb2   :  { %2703 = vmatmul.mubr.msk.f32.vlgmr.msra.gmra.mrb[14].mxu1 %vm124_vm1, %v1377_v26 }
 0xf7d   :  { %v3411_v27 = vpop.f32.mrb[12].mxu1 }
 0xf7e   :  { %v3413_v28 = vpop.f32.mrb[13].mxu1 }
 0xf85   :  { %v2704_v29 = vpop.f32.mrb[14].mxu1 }
 0xf86   :  { %v1466_v31 = vmul.f32 0.35355338, %v2704_v29  ;;  %v1456_v32 = vpop.f32.mrb[15].mxu1 }
 0xf87   :  { %v1465_v34 = vmul.f32 0.35355338, %v1456_v32 }
 0xf88   :  { %v1468_v35 = vsel %vm3204_vm7, %v1466_v31, -1e+30 }
 0xf89   :  { %v1472_v36 = vsel %vm212_vm8, %v1468_v35, -inf  ;;  %v1467_v41 = vsel %vm3208_vm9, %v1465_v34, -1e+30 }
 0xf8a   :  { %1473 = vmax.xlane.f32.xlu1 %v1472_v36  ;;  %v1469_v42 = vsel %vm212_vm8, %v1467_v41, -inf }
 0xf8b   :  { %1470 = vmax.xlane.f32.xlu0 %v1469_v42 }
 0xf9b   :  { %2988 = vrot.lane.b32.xlu1 %v3377_v48, %s3117_s25 }
 0xf9f   :  { %1578 = vrot.lane.b32.xlu1 %v3371_v47, %s3118_s26 }
 0xfa3   :  { %1580 = vrot.lane.b32.xlu1 %v3369_v39, %s3118_s26 }
0x1017   :  { %v1474_v43 = vpop.xlane.xlu1 %1473 }
0x1018   :  { %v1476_v44 = vsub.f32 %v1468_v35, %v1474_v43  ;;  %v1471_v40 = vpop.xlane.xlu0 %1470 }
0x1019   :  { %v1475_v51 = vsub.f32 %v1467_v41, %v1471_v40 }
0x101a   :  { %v1479_v53 = vmul.f32 1.442695, %v1476_v44 }
0x101b   :  { %v1477_v54 = vmul.f32 1.442695, %v1475_v51  ;;  %v2989_v55 = vpop.permute.xlu1 %2988 }
0x101c   :  { %3076 = vpow2.f32 %v1479_v53  ;;  %v2991_v56 = vunpack.i.h.bf16 %v2989_v55  ;;  %v2990_v57 = vunpack.i.l.bf16 %v2989_v55 }
0x101d   :  { %3078 = vpow2.f32 %v1477_v54 }
0x101e   :  { %v2861_v58 = vpack.c.bf16 %v2991_v56, %v2990_v57 }
0x101f   :  { %v1579_v8 = vpop.permute.xlu1 %1578 }
0x1020   :  { %2862 = vmatprep.subr.bf16.mxu0 %v2861_v58 }
0x1021   :  { %2864 = vmatpush3.bf16.msra.mxu0 %v2861_v58 }
0x1023   :  { %v1581_v12 = vpop.permute.xlu1 %1580 }
0x1026   :  { %v3077_v59 = vpop.eup %3076 }
0x1027   :  { %v1484_v60 = vsel %vm212_vm8, %v3077_v59, 0.0  ;;  %v3079_v61 = vpop.eup %3078 }
0x1028   :  { %1485 = vadd.xlane.f32.xlu0 %v1484_v60  ;;  %v1481_v62 = vsel %vm212_vm8, %v3079_v61, 0.0 }
0x102c   :  { %1482 = vadd.xlane.f32.xlu0 %v1481_v62 }
0x1042   :  { %2993 = vrot.lane.b32.xlu0 %v3377_v48, %s3116_s24 }
0x10b5   :  { %v1486_v63 = vpop.xlane.xlu0 %1485 }
0x10b6   :  { %3080 = vrcp.f32 %v1486_v63 }
0x10b9   :  { %v1483_v0 = vpop.xlane.xlu0 %1482 }
0x10ba   :  { %3082 = vrcp.f32 %v1483_v0 }
0x10bd   :  { %v2994_v1 = vpop.permute.xlu0 %2993 }
0x10be   :  { %v2996_v2 = vunpack.i.h.bf16 %v2994_v1  ;;  %v2995_v3 = vunpack.i.l.bf16 %v2994_v1 }
0x10c0   :  { %v2865_v4 = vpack.c.bf16 %v2996_v2, %v2995_v3  ;;  %v3081_v38 = vpop.eup %3080 }
0x10c1   :  { %v1490_v37 = vmul.f32 %v3081_v38, %v3077_v59  ;;  %v3477_v38 = vpack.i.bf16 %v3318_v52, %v3311_v50 }
0x10c2   :  { %2867 = vmatprep.subr.msk.bf16.mxu0 %vm3188_vm2, %v2865_v4 }
0x10c4   :  { %v3083_v9 = vpop.eup %3082 }
0x10c5   :  { %v1489_v6 = vmul.f32 %v3083_v9, %v3079_v61 }
0x10c7   :  { %2709 = vmatprep.mubr.msk.f32.mxu0 %vm212_vm8, %v1489_v6 }
0x10c8   :  { %2710 = vmatmul.mubr.msk.f32.vlgmr.msra.gmra.mrb[12].mxu0 %vm212_vm8, %v1490_v37 }
0x10c9   :  { %2870 = vmatpush3.bf16.xpose.msk.msra.mxu0 %vm3188_vm2, %v2865_v4  ;;  %2716 = vmatprep.mubr.msk.f32.mxu0 %vm124_vm1, %v1579_v8 }
0x10d0   :  { %2717 = vmatmul.mubr.msk.f32.vlgmr.msra.gmra.mrb[14].mxu0 %vm124_vm1, %v1581_v12 }
0x119b   :  { %v3439_v13 = vpop.f32.mrb[12].mxu0 }
0x119c   :  { %v3441_v7 = vpop.f32.mrb[13].mxu0 }
0x11a3   :  { %v2718_v15 = vpop.f32.mrb[14].mxu0 }
0x11a4   :  { %v1670_v16 = vmul.f32 0.35355338, %v2718_v15  ;;  %v1660_v5 = vpop.f32.mrb[15].mxu0 }
0x11a5   :  { %v1669_v17 = vmul.f32 0.35355338, %v1660_v5 }
0x11a6   :  { %v1672_v18 = vsel %vm3204_vm7, %v1670_v16, -1e+30 }
0x11a7   :  { %v1676_v19 = vsel %vm212_vm8, %v1672_v18, -inf  ;;  %v1671_v20 = vsel %vm3208_vm9, %v1669_v17, -1e+30  ;;  %v3488_v17 = vpack.i.bf16 %v3306_v49, %v3301_v10 }
0x11a8   :  { %1677 = vmax.xlane.f32.xlu1 %v1676_v19  ;;  %v1673_v21 = vsel %vm212_vm8, %v1671_v20, -inf }
0x11a9   :  { %1674 = vmax.xlane.f32.xlu0 %v1673_v21 }
0x11b9   :  { %2998 = vrot.lane.b32.xlu1 %v3377_v48, %s3121_s29 }
0x11bd   :  { %1782 = vrot.lane.b32.xlu1 %v3371_v47, %s3120_s28 }
0x11c1   :  { %1784 = vrot.lane.b32.xlu1 %v3369_v39, %s3120_s28 }
0x1235   :  { %v1678_v22 = vpop.xlane.xlu1 %1677 }
0x1236   :  { %v1680_v23 = vsub.f32 %v1672_v18, %v1678_v22  ;;  %v1675_v24 = vpop.xlane.xlu0 %1674 }
0x1237   :  { %v1679_v25 = vsub.f32 %v1671_v20, %v1675_v24 }
0x1238   :  { %v1683_v26 = vmul.f32 1.442695, %v1680_v23 }
0x1239   :  { %v1681_v29 = vmul.f32 1.442695, %v1679_v25  ;;  %v2999_v31 = vpop.permute.xlu1 %2998 }
0x123a   :  { %3084 = vpow2.f32 %v1683_v26  ;;  %v3001_v32 = vunpack.i.h.bf16 %v2999_v31  ;;  %v3000_v34 = vunpack.i.l.bf16 %v2999_v31 }
0x123b   :  { %3086 = vpow2.f32 %v1681_v29 }
0x123c   :  { %v2871_v35 = vpack.c.bf16 %v3001_v32, %v3000_v34 }
0x123d   :  { %v1783_v58 = vpop.permute.xlu1 %1782 }
0x123e   :  { %2872 = vmatprep.subr.bf16.mxu1 %v2871_v35 }
0x123f   :  { %2874 = vmatpush3.bf16.msra.mxu1 %v2871_v35 }
0x1241   :  { %v1785_v59 = vpop.permute.xlu1 %1784 }
0x1244   :  { %v3085_v36 = vpop.eup %3084 }
0x1245   :  { %v1688_v47 = vsel %vm212_vm8, %v3085_v36, 0.0  ;;  %v3087_v41 = vpop.eup %3086 }
0x1246   :  { %1689 = vadd.xlane.f32.xlu0 %v1688_v47  ;;  %v1685_v39 = vsel %vm212_vm8, %v3087_v41, 0.0 }
0x124a   :  { %1686 = vadd.xlane.f32.xlu0 %v1685_v39 }
0x1260   :  { %3003 = vrot.lane.b32.xlu0 %v3377_v48, %s3119_s27 }
0x12d3   :  { %v1690_v42 = vpop.xlane.xlu0 %1689 }
0x12d4   :  { %3088 = vrcp.f32 %v1690_v42 }
0x12d7   :  { %v1687_v43 = vpop.xlane.xlu0 %1686 }
0x12d8   :  { %3090 = vrcp.f32 %v1687_v43 }
0x12db   :  { %v3004_v44 = vpop.permute.xlu0 %3003 }
0x12dc   :  { %v3006_v40 = vunpack.i.h.bf16 %v3004_v44  ;;  %v3005_v51 = vunpack.i.l.bf16 %v3004_v44 }
0x12de   :  { %v2875_v53 = vpack.c.bf16 %v3006_v40, %v3005_v51  ;;  %v3089_v54 = vpop.eup %3088 }
0x12df   :  { %v1694_v57 = vmul.f32 %v3089_v54, %v3085_v36 }
0x12e0   :  { %2877 = vmatprep.subr.msk.bf16.mxu1 %vm3188_vm2, %v2875_v53 }
0x12e2   :  { %v3091_v55 = vpop.eup %3090 }
0x12e3   :  { %v1693_v56 = vmul.f32 %v3091_v55, %v3087_v41 }
0x12e5   :  { %2723 = vmatprep.mubr.msk.f32.mxu1 %vm212_vm8, %v1693_v56 }
0x12e6   :  { %2724 = vmatmul.mubr.msk.f32.vlgmr.msra.gmra.mrb[16].mxu1 %vm212_vm8, %v1694_v57 }
0x12e7   :  { %2880 = vmatpush3.bf16.xpose.msk.msra.mxu1 %vm3188_vm2, %v2875_v53  ;;  %2730 = vmatprep.mubr.msk.f32.mxu1 %vm124_vm1, %v1783_v58 }
0x12ee   :  { %2731 = vmatmul.mubr.msk.f32.vlgmr.msra.gmra.mrb[18].mxu1 %vm124_vm1, %v1785_v59 }
0x13b9   :  { %v2725_v60 = vpop.f32.mrb[16].mxu1 }
0x13ba   :  { %v1773_v61 = vpop.f32.mrb[17].mxu1 }
0x13c1   :  { %v2732_v62 = vpop.f32.mrb[18].mxu1 }
0x13c2   :  { %v1874_v63 = vmul.f32 0.35355338, %v2732_v62  ;;  %v1864_v0 = vpop.f32.mrb[19].mxu1 }
0x13c3   :  { %v1873_v1 = vmul.f32 0.35355338, %v1864_v0 }
0x13c4   :  { %v1876_v2 = vsel %vm3204_vm7, %v1874_v63, -1e+30 }
0x13c5   :  { %v1880_v3 = vsel %vm212_vm8, %v1876_v2, -inf  ;;  %v1875_v14 = vsel %vm3208_vm9, %v1873_v1, -1e+30 }
0x13c6   :  { %1881 = vmax.xlane.f32.xlu1 %v1880_v3  ;;  %v1877_v4 = vsel %vm212_vm8, %v1875_v14, -inf }
0x13c7   :  { %1878 = vmax.xlane.f32.xlu0 %v1877_v4  ;;  %v2153_v4 = vld [vmem:[%s3575_s1 + $0x70] sm:$0xff] }
0x13d7   :  { %3008 = vrot.lane.b32.xlu1 %v3377_v48, %s3123_s3 }
0x13db   :  { %3018 = vrot.lane.b32.xlu1 %v3477_v38, %s3113_s0 }
0x13df   :  { %1988 = vrot.lane.b32.xlu1 %v3441_v7, %s3122_s30 }
0x13e3   :  { %1996 = vrot.lane.b32.xlu1 %v1773_v61, %s3124_s4 }
0x1453   :  { %v1882_v30 = vpop.xlane.xlu1 %1881 }
0x1454   :  { %v1884_v33 = vsub.f32 %v1876_v2, %v1882_v30  ;;  %v1879_v9 = vpop.xlane.xlu0 %1878  ;;  %v2154_v30 = vld [vmem:[%s3575_s1 + $0x78] sm:$0xff] }
0x1455   :  { %v1883_v6 = vsub.f32 %v1875_v14, %v1879_v9  ;;  %v2152_v14 = vld [vmem:[%s3575_s1 + $0x68] sm:$0xff] }
0x1456   :  { %v1887_v37 = vmul.f32 1.442695, %v1884_v33  ;;  %v2905_v33 = vpack.c.bf16 %v2154_v30, %v2153_v4  ;;  %v2156_v9 = vld [vmem:[%s3575_s1 + $0x88] sm:$0xff] }
0x1457   :  { %v1885_v8 = vmul.f32 1.442695, %v1883_v6  ;;  %v3009_v12 = vpop.permute.xlu1 %3008 }
0x1458   :  { %v3011_v48 = vunpack.i.h.bf16 %v3009_v12  ;;  %v3010_v15 = vunpack.i.l.bf16 %v3009_v12 }
0x1459   :  { %3092 = vpow2.f32 %v1885_v8 }
0x145a   :  { %v2881_v50 = vpack.c.bf16 %v3011_v48, %v3010_v15  ;;  %3094 = vpow2.f32 %v1887_v37 }
0x145b   :  { %v3019_v24 = vpop.permute.xlu1 %3018 }
0x145c   :  { %2882 = vmatprep.subr.bf16.mxu0 %v2881_v50  ;;  %v3021_v10 = vunpack.i.h.bf16 %v3019_v24  ;;  %v3020_v49 = vunpack.i.l.bf16 %v3019_v24 }
0x145d   :  { %2884 = vmatpush3.bf16.msra.mxu0 %v2881_v50 }
0x145f   :  { %v1989_v36 = vpop.permute.xlu1 %1988 }
0x1460   :  { %v2010_v39 = vsel %vm124_vm1, %v3413_v28, %v1989_v36 }
0x1463   :  { %v3093_v52 = vpop.eup %3092  ;;  %v1997_v41 = vpop.permute.xlu1 %1996 }
0x1464   :  { %v1889_v16 = vsel %vm212_vm8, %v3093_v52, 0.0  ;;  %v3095_v7 = vpop.eup %3094  ;;  %v2012_v43 = vsel %vm212_vm8, %v2010_v39, %v1997_v41 }
0x1465   :  { %1890 = vadd.xlane.f32.xlu0 %v1889_v16  ;;  %v1892_v5 = vsel %vm212_vm8, %v3095_v7, 0.0 }
0x1469   :  { %1893 = vadd.xlane.f32.xlu0 %v1892_v5 }
0x147f   :  { %3013 = vrot.lane.b32.xlu0 %v3488_v17, %s3113_s0 }
0x1483   :  { %1990 = vrot.lane.b32.xlu0 %v3439_v13, %s3122_s30  ;;  %v2889_v13 = vpack.c.bf16 %v3021_v10, %v3020_v49 }
0x1487   :  { %1998 = vrot.lane.b32.xlu0 %v2725_v60, %s3124_s4 }
0x14f2   :  { %v1891_v18 = vpop.xlane.xlu0 %1890 }
0x14f3   :  { %3096 = vrcp.f32 %v1891_v18 }
0x14f6   :  { %v1894_v19 = vpop.xlane.xlu0 %1893 }
0x14f7   :  { %3098 = vrcp.f32 %v1894_v19 }
0x14fa   :  { %v3014_v20 = vpop.permute.xlu0 %3013 }
0x14fb   :  { %v3016_v21 = vunpack.i.h.bf16 %v3014_v20  ;;  %v3015_v22 = vunpack.i.l.bf16 %v3014_v20 }
0x14fd   :  { %v3097_v23 = vpop.eup %3096  ;;  %v2885_v25 = vpack.c.bf16 %v3016_v21, %v3015_v22 }
0x14fe   :  { %v1897_v26 = vmul.f32 %v3097_v23, %v3093_v52  ;;  %v1991_v35 = vpop.permute.xlu0 %1990 }
0x14ff   :  { %2886 = vmatprep.subr.bf16.mxu0 %v2885_v25  ;;  %v2011_v44 = vsel %vm124_vm1, %v3411_v27, %v1991_v35 }
0x1500   :  { %2737 = vmatprep.mubr.msk.f32.mxu0 %vm212_vm8, %v1897_v26 }
0x1501   :  { %v3099_v29 = vpop.eup %3098 }
0x1502   :  { %v1898_v31 = vmul.f32 %v3099_v29, %v3095_v7  ;;  %v1999_v47 = vpop.permute.xlu0 %1998 }
0x1503   :  { %v2013_v51 = vsel %vm212_vm8, %v2011_v44, %v1999_v47 }
0x1504   :  { %2738 = vmatmul.mubr.msk.f32.vlgmr.msra.gmra.mrb[16].mxu0 %vm212_vm8, %v1898_v31  ;;  %v2485_v31 = vld [vmem:[%s3575_s1 + $0xa2] ss:$0 sm:$0xff] }
0x1505   :  { %2888 = vmatpush3.bf16.msra.mxu0 %v2885_v25 }
0x1506   :  { %2890 = vmatprep.subr.bf16.mxu0 %v2889_v13 }
0x1509   :  { %2892 = vmatpush3.bf16.msra.mxu0 %v2889_v13 }
0x15d7   :  { %v2739_v32 = vpop.f32.mrb[16].mxu0 }
0x15d8   :  { %2006 = vrot.lane.b32.xlu0 %v2739_v32, %s3125_s13  ;;  %v1977_v34 = vpop.f32.mrb[17].mxu0  ;;  %v2157_v32 = vld [vmem:[%s3575_s1 + $0x90] sm:$0xff] }
0x15d9   :  { %2004 = vrot.lane.b32.xlu1 %v1977_v34, %s3125_s13  ;;  %v2158_v34 = vld [vmem:[%s3575_s1 + $0x98] sm:$0xff] }
0x15da   :  { %v2913_v35 = vpack.c.bf16 %v2158_v34, %v2157_v32 }
0x164a   :  { %v2007_v42 = vpop.permute.xlu0 %2006 }
0x164b   :  { %v2005_v40 = vpop.permute.xlu1 %2004  ;;  %v2015_v54 = vsel %vm962_vm10, %v2013_v51, %v2007_v42 }
0x164c   :  { %v2014_v53 = vsel %vm962_vm10, %v2012_v43, %v2005_v40 }
0x164d   :  { %2748 = vmatprep.mubr.msk.f32.mxu0 %vm36_vm0, %v2014_v53 }
0x164e   :  { %2749 = vmatmul.mubr.msk.f32.vlgmr.msra.gmra.mrb[18].mxu0 %vm36_vm0, %v2015_v54 }
0x1721   :  { %v2750_v55 = vpop.f32.mrb[18].mxu0 }
0x1722   :  { %v2114_v28 = vadd.f32 %v2750_v55, %v3365_v46  ;;  %v2104_v56 = vpop.f32.mrb[19].mxu0 }
0x1723   :  { %v2113_v57 = vadd.f32 %v2104_v56, %v3360_v45  ;;  %v2151_v45 = vld [vmem:[%s3575_s1 + $0x60] sm:$0xff] }
0x1724   :  { %v2118_v58 = vsel %vm36_vm0, %v2114_v28, 0.0 }
0x1725   :  { %2119 = vadd.xlane.f32.xlu0 %v2118_v58  ;;  %v2115_v27 = vsel %vm36_vm0, %v2113_v57, 0.0  ;;  %v2490_v58 = vld [vmem:[%s3575_s1 + $0xa1] ss:$0 sm:$0xff] }
0x1726   :  { %2116 = vadd.xlane.f32.xlu1 %v2115_v27 }
0x17b2   :  { %v2120_v59 = vpop.xlane.xlu0 %2119 }
0x17b3   :  { %v2122_v60 = vmul.f32 0.03125, %v2120_v59  ;;  %v2117_v61 = vpop.xlane.xlu1 %2116 }
0x17b4   :  { %v2121_v62 = vmul.f32 0.03125, %v2117_v61 }
0x17b5   :  { %v2124_v63 = vsub.f32 %v2114_v28, %v2122_v60 }
0x17b6   :  { %v2123_v0 = vsub.f32 %v2113_v57, %v2121_v62 }
0x17b7   :  { %v2126_v1 = vmul.f32 %v2124_v63, %v2124_v63 }
0x17b8   :  { %v2125_v2 = vmul.f32 %v2123_v0, %v2123_v0 }
0x17b9   :  { %v2130_v3 = vsel %vm36_vm0, %v2126_v1, 0.0 }
0x17ba   :  { %2131 = vadd.xlane.f32.xlu1 %v2130_v3  ;;  %v2127_v46 = vsel %vm36_vm0, %v2125_v2, 0.0 }
0x17bb   :  { %2128 = vadd.xlane.f32.xlu0 %v2127_v46 }
0x17cb   :  { %3028 = vrot.lane.b32.xlu1 %v3477_v38, %s3115_s23  ;;  %v2901_v38 = vpack.c.bf16 %v2152_v14, %v2151_v45 }
0x17cd   :  { %2902 = vmatprep.subr.bf16.mxu0 %v2901_v38 }
0x17ce   :  { %2904 = vmatpush3.bf16.msra.mxu0 %v2901_v38 }
0x17cf   :  { %2141 = vrot.lane.b32.xlu1 %v3341_v11, %s3115_s23  ;;  %2906 = vmatprep.subr.bf16.mxu0 %v2905_v33 }
0x17d1   :  { %3023 = vrot.lane.b32.xlu0 %v3488_v17, %s3115_s23 }
0x17d2   :  { %2908 = vmatpush3.bf16.msra.mxu0 %v2905_v33 }
0x17d3   :  { %2261 = vrot.lane.b32.xlu1 %v2485_v31, %s3115_s23 }
0x17d5   :  { %2146 = vrot.lane.b32.xlu0 %v3341_v11, %s3126_s21  ;;  %v2155_v11 = vld [vmem:[%s3575_s1 + $0x80] sm:$0xff] }
0x17d6   :  { %v2909_v6 = vpack.c.bf16 %v2156_v9, %v2155_v11 }
0x17d8   :  { %2910 = vmatprep.subr.bf16.mxu0 %v2909_v6 }
0x17d9   :  { %2912 = vmatpush3.bf16.msra.mxu0 %v2909_v6 }
0x17da   :  { %2914 = vmatprep.subr.bf16.mxu0 %v2913_v35 }
0x17dd   :  { %2916 = vmatpush3.bf16.msra.mxu0 %v2913_v35 }
0x1847   :  { %v2132_v37 = vpop.xlane.xlu1 %2131 }
0x1848   :  { %v2134_v8 = vmul.f32 0.03125, %v2132_v37  ;;  %v2129_v12 = vpop.xlane.xlu0 %2128 }
0x1849   :  { %v2133_v48 = vmul.f32 0.03125, %v2129_v12 }
0x184a   :  { %v2136_v15 = vadd.f32 1e-05, %v2134_v8 }
0x184b   :  { %v2135_v50 = vadd.f32 1e-05, %v2133_v48  ;;  %v3029_v52 = vpop.permute.xlu1 %3028 }
0x184c   :  { %3100 = vrsqrt.f32 %v2136_v15  ;;  %v3024_v16 = vpop.permute.xlu0 %3023  ;;  %v3031_v7 = vunpack.i.h.bf16 %v3029_v52  ;;  %v3030_v5 = vunpack.i.l.bf16 %v3029_v52 }
0x184d   :  { %3102 = vrsqrt.f32 %v2135_v50  ;;  %v3026_v17 = vunpack.i.h.bf16 %v3024_v16  ;;  %v3025_v18 = vunpack.i.l.bf16 %v3024_v16 }
0x184e   :  { %v2897_v20 = vpack.c.bf16 %v3031_v7, %v3030_v5 }
0x184f   :  { %v2893_v19 = vpack.c.bf16 %v3026_v17, %v3025_v18  ;;  %v2142_v22 = vpop.permute.xlu1 %2141 }
0x1850   :  { %v2147_v49 = vpop.permute.xlu0 %2146 }
0x1851   :  { %2894 = vmatprep.subr.bf16.mxu1 %v2893_v19 }
0x1852   :  { %2896 = vmatpush3.bf16.msra.mxu1 %v2893_v19 }
0x1853   :  { %2898 = vmatprep.subr.bf16.mxu1 %v2897_v20  ;;  %v2262_v44 = vpop.permute.xlu1 %2261 }
0x1856   :  { %v3101_v21 = vpop.eup %3100  ;;  %2900 = vmatpush3.bf16.msra.mxu1 %v2897_v20 }
0x1857   :  { %v3103_v23 = vpop.eup %3102  ;;  %v2140_v24 = vmul.f32 %v3101_v21, %v2124_v63 }
0x1858   :  { %v2139_v25 = vmul.f32 %v3103_v23, %v2123_v0 }
0x1859   :  { %v2145_v10 = vmul.f32 %v2142_v22, %v2140_v24 }
0x185a   :  { %v2144_v26 = vmul.f32 %v2142_v22, %v2139_v25 }
0x185b   :  { %v2150_v13 = vadd.f32 %v2147_v49, %v2145_v10 }
0x185c   :  { %v2149_v29 = vadd.f32 %v2147_v49, %v2144_v26 }
0x185e   :  { %2759 = vmatprep.mubr.msk.f32.mxu1 %vm36_vm0, %v2149_v29 }
0x185f   :  { %2760 = vmatmul.mubr.msk.f32.vlgmr.msra.gmra.mrb[20].mxu1 %vm36_vm0, %v2150_v13 }
0x1932   :  { %v2761_v36 = vpop.f32.mrb[20].mxu1 }
0x1933   :  { %v2255_v47 = vadd.f32 %v2761_v36, %v2485_v31  ;;  %v2249_v41 = vpop.f32.mrb[21].mxu1 }
0x1934   :  { %v2250_v39 = vadd.f32 %v2485_v31, %v2249_v41 }
0x1935   :  { %v2259_v43 = vmax.f32 %v2255_v47, 0.0 }
0x1936   :  { %v2258_v42 = vmax.f32 %v2250_v39, 0.0 }
0x1938   :  { %2778 = vmatprep.mubr.msk.f32.mxu0 %vm2264_vm11, %v2258_v42 }
0x1939   :  { %2779 = vmatmul.mubr.msk.f32.vlgmr.msra.gmra.mrb[20].mxu0 %vm2264_vm11, %v2259_v43 }
0x1a0c   :  { %v2780_v40 = vpop.f32.mrb[20].mxu0 }
0x1a0d   :  { %v2343_v51 = vadd.f32 %v2780_v40, %v2262_v44  ;;  %v2337_v53 = vpop.f32.mrb[21].mxu0 }
0x1a0e   :  { %v2338_v54 = vadd.f32 %v2337_v53, %v2262_v44 }
0x1a0f   :  { %v2347_v55 = vadd.f32 %v2343_v51, %v2150_v13 }
0x1a10   :  { %v2346_v28 = vadd.f32 %v2338_v54, %v2149_v29 }
0x1a11   :  { %v2351_v56 = vsel %vm36_vm0, %v2347_v55, 0.0 }
0x1a12   :  { %2352 = vadd.xlane.f32.xlu1 %v2351_v56  ;;  %v2348_v57 = vsel %vm36_vm0, %v2346_v28, 0.0 }
0x1a13   :  { %2349 = vadd.xlane.f32.xlu0 %v2348_v57 }
0x1a23   :  { %2381 = vrot.lane.b32.xlu1 %v2490_v58, %s3113_s0 }
0x1a27   :  { %2412 = vrot.lane.b32.xlu1 %v2490_v58, %s3115_s23 }
0x1a9f   :  { %v2353_v27 = vpop.xlane.xlu1 %2352 }
0x1aa0   :  { %v2355_v59 = vmul.f32 0.03125, %v2353_v27  ;;  %v2350_v60 = vpop.xlane.xlu0 %2349 }
0x1aa1   :  { %v2354_v61 = vmul.f32 0.03125, %v2350_v60 }
0x1aa2   :  { %v2357_v62 = vsub.f32 %v2347_v55, %v2355_v59 }
0x1aa3   :  { %v2356_v63 = vsub.f32 %v2346_v28, %v2354_v61  ;;  %v2382_v9 = vpop.permute.xlu1 %2381 }
0x1aa4   :  { %v2359_v2 = vmul.f32 %v2357_v62, %v2357_v62 }
0x1aa5   :  { %v2358_v0 = vmul.f32 %v2356_v63, %v2356_v63 }
0x1aa6   :  { %v2363_v3 = vsel %vm36_vm0, %v2359_v2, 0.0 }
0x1aa7   :  { %v2360_v1 = vsel %vm36_vm0, %v2358_v0, 0.0  ;;  %v2413_v31 = vpop.permute.xlu1 %2412 }
0x1aa8   :  { %2361 = vadd.xlane.f32.xlu0 %v2360_v1 }
0x1aac   :  { %2364 = vadd.xlane.f32.xlu0 %v2363_v3 }
0x1b35   :  { %v2362_v46 = vpop.xlane.xlu0 %2361 }
0x1b36   :  { %v2366_v45 = vmul.f32 0.03125, %v2362_v46 }
0x1b38   :  { %v2368_v14 = vadd.f32 1e-05, %v2366_v45 }
0x1b39   :  { %v2365_v4 = vpop.xlane.xlu0 %2364 }
0x1b3a   :  { %3104 = vrsqrt.f32 %v2368_v14  ;;  %v2367_v38 = vmul.f32 0.03125, %v2365_v4 }
0x1b3c   :  { %v2369_v30 = vadd.f32 1e-05, %v2367_v38 }
0x1b3e   :  { %3106 = vrsqrt.f32 %v2369_v30 }
0x1b44   :  { %v3105_v33 = vpop.eup %3104 }
0x1b45   :  { %v2372_v11 = vmul.f32 %v3105_v33, %v2356_v63 }
0x1b47   :  { %v2378_v6 = vmul.f32 %v2490_v58, %v2372_v11 }
0x1b48   :  { %v3107_v37 = vpop.eup %3106 }
0x1b49   :  { %v2373_v8 = vmul.f32 %v3107_v37, %v2357_v62  ;;  %v2384_v12 = vadd.f32 %v2382_v9, %v2378_v6 }
0x1b4b   :  { %v2379_v48 = vmul.f32 %v2490_v58, %v2373_v8  ;;  %v2386_v15 = vsel %vm36_vm0, %v2384_v12, 0.0 }
0x1b4c   :  { %2387 = vadd.xlane.f32.xlu0 %v2386_v15 }
0x1b4d   :  { %v2385_v50 = vadd.f32 %v2382_v9, %v2379_v48 }
0x1b4f   :  { %v2389_v52 = vsel %vm36_vm0, %v2385_v50, 0.0 }
0x1b50   :  { %2390 = vadd.xlane.f32.xlu0 %v2389_v52 }
0x1bd9   :  { %v2388_v16 = vpop.xlane.xlu0 %2387 }
0x1bda   :  { %v2392_v7 = vmul.f32 0.03125, %v2388_v16 }
0x1bdc   :  { %v2394_v5 = vsub.f32 %v2384_v12, %v2392_v7 }
0x1bdd   :  { %v2391_v17 = vpop.xlane.xlu0 %2390 }
0x1bde   :  { %v2393_v18 = vmul.f32 0.03125, %v2391_v17  ;;  %v2396_v19 = vmul.f32 %v2394_v5, %v2394_v5 }
0x1be0   :  { %v2395_v20 = vsub.f32 %v2385_v50, %v2393_v18  ;;  %v2398_v21 = vsel %vm36_vm0, %v2396_v19, 0.0 }
0x1be1   :  { %2399 = vadd.xlane.f32.xlu0 %v2398_v21 }
0x1be2   :  { %v2397_v22 = vmul.f32 %v2395_v20, %v2395_v20 }
0x1be4   :  { %v2401_v23 = vsel %vm36_vm0, %v2397_v22, 0.0 }
0x1be5   :  { %2402 = vadd.xlane.f32.xlu0 %v2401_v23 }
0x1bfb   :  { %2417 = vrot.lane.b32.xlu0 %v2490_v58, %s3126_s21 }
0x1c6e   :  { %v2400_v24 = vpop.xlane.xlu0 %2399 }
0x1c6f   :  { %v2404_v25 = vmul.f32 0.03125, %v2400_v24 }
0x1c71   :  { %v2406_v10 = vadd.f32 1e-05, %v2404_v25 }
0x1c72   :  { %v2403_v49 = vpop.xlane.xlu0 %2402 }
0x1c73   :  { %3108 = vrsqrt.f32 %v2406_v10  ;;  %v2405_v26 = vmul.f32 0.03125, %v2403_v49 }
0x1c75   :  { %v2407_v29 = vadd.f32 1e-05, %v2405_v26 }
0x1c76   :  { %v2418_v34 = vpop.permute.xlu0 %2417 }
0x1c77   :  { %3110 = vrsqrt.f32 %v2407_v29 }
0x1c7d   :  { %v3109_v13 = vpop.eup %3108 }
0x1c7e   :  { %v2410_v32 = vmul.f32 %v3109_v13, %v2394_v5 }
0x1c80   :  { %v2415_v35 = vmul.f32 %v2413_v31, %v2410_v32 }
0x1c81   :  { %v3111_v36 = vpop.eup %3110 }
0x1c82   :  { %v2411_v47 = vmul.f32 %v3111_v36, %v2395_v20  ;;  %v2420_v41 = vadd.f32 %v2418_v34, %v2415_v35 }
0x1c84   :  { %v2416_v39 = vmul.f32 %v2413_v31, %v2411_v47  ;;  %2422 = vst.msk [vmem:[%s3577_s2] sm:$0xff] %vm36_vm0, %v2420_v41 }
0x1c86   :  { %v2421_v42 = vadd.f32 %v2418_v34, %v2416_v39 }
0x1c88   :  { %2423 = vst.msk [vmem:[%s3577_s2 + $0x8] sm:$0xff] %vm36_vm0, %v2421_v42 }

</bundles_post_ra>
